<compile_context>
chip_gen: v7x
topology: tpu7x:2x2x1
jax: 0.10.0
libtpu: 0.0.40
codegen_flags: <defaults>
</compile_context>

<pallas_src>
import functools

import jax
import jax.numpy as jnp
import numpy as np
from jax import lax
from jax.experimental import pallas as pl
from jax.experimental.pallas import tpu as pltpu

EPS = 1e-5


def _conv3x3_stats_kernel(y_ref, scale_ref, shift_ref, w_ref,
                          out_ref, psum_ref, psumsq_ref,
                          pad_ref, patch_ref,
                          *, H, W, apply_affine_relu):
    """One image per grid step.

    t   = relu(y * scale + shift)   (f32; identity for the first conv)
    out = conv3x3(t, w) as ONE im2col matmul (H*W, 9*Cin) @ (9*Cin, Cout)
          on the MXU with bf16 operands and f32 accumulation.
    psum / psumsq = per-image per-channel partial BatchNorm statistics of out.
    """
    Cin = y_ref.shape[-1]

    t = y_ref[0]                                          # (H*W, Cin) f32
    if apply_affine_relu:
        t = jnp.maximum(t * scale_ref[...] + shift_ref[...], 0.0)
    t = t.reshape(H, W, Cin)

    # conv padding=1: padded copy of the image in VMEM scratch.  Only the
    # 1-pixel border is zeroed; the interior is overwritten every step.
    zrow = jnp.zeros((1, W + 2, Cin), jnp.float32)
    zcol = jnp.zeros((H, 1, Cin), jnp.float32)
    pad_ref[0:1, :, :] = zrow
    pad_ref[H + 1:H + 2, :, :] = zrow
    pad_ref[1:H + 1, 0:1, :] = zcol
    pad_ref[1:H + 1, W + 1:W + 2, :] = zcol
    pad_ref[1:H + 1, 1:W + 1, :] = t

    # im2col once per tile: the 9 shifted windows laid side by side along the
    # lane axis (K fused over the taps), one reshape, one MXU matmul.
    for dy in range(3):
        for dx in range(3):
            k = dy * 3 + dx
            patch_ref[:, :, k * Cin:(k + 1) * Cin] = \
                pad_ref[dy:dy + H, dx:dx + W, :]

    patch = patch_ref[...].reshape(H * W, 9 * Cin).astype(jnp.bfloat16)
    acc = jnp.dot(patch, w_ref[...],
                  preferred_element_type=jnp.float32)     # (H*W, Cout) f32

    out_ref[0] = acc
    psum_ref[0] = jnp.sum(acc, axis=0, keepdims=True)
    psumsq_ref[0] = jnp.sum(acc * acc, axis=0, keepdims=True)


def _conv3x3_bn_stats(y, scale, shift, w_taps, *, H, W, apply_affine_relu):
    """Gridded pallas_call: one image per block, parallel over the batch."""
    B = y.shape[0]
    Cin = y.shape[-1]
    Cout = w_taps.shape[-1]

    kernel = functools.partial(_conv3x3_stats_kernel, H=H, W=W,
                               apply_affine_relu=apply_affine_relu)

    # per-step VMEM footprint (double-buffered blocks + scratch + acc) + headroom
    in_blk = H * W * Cin * 4
    out_blk = H * W * Cout * 4
    w_bytes = 9 * Cin * Cout * 2
    scratch_bytes = (H + 2) * (W + 2) * Cin * 4 + H * W * 9 * Cin * 4
    est = 2 * (in_blk + out_blk + w_bytes) + scratch_bytes + 2 * out_blk
    vmem_limit = int(min(56 * 2 ** 20, max(32 * 2 ** 20, 2 * est)))

    return pl.pallas_call(
        kernel,
        grid=(B,),
        in_specs=[
            pl.BlockSpec((1, H * W, Cin), lambda b: (b, 0, 0)),
            pl.BlockSpec((1, Cin), lambda b: (0, 0)),
            pl.BlockSpec((1, Cin), lambda b: (0, 0)),
            pl.BlockSpec((9 * Cin, Cout), lambda b: (0, 0)),
        ],
        out_specs=[
            pl.BlockSpec((1, H * W, Cout), lambda b: (b, 0, 0)),
            pl.BlockSpec((1, 1, Cout), lambda b: (b, 0, 0)),
            pl.BlockSpec((1, 1, Cout), lambda b: (b, 0, 0)),
        ],
        out_shape=[
            jax.ShapeDtypeStruct((B, H * W, Cout), jnp.float32),
            jax.ShapeDtypeStruct((B, 1, Cout), jnp.float32),
            jax.ShapeDtypeStruct((B, 1, Cout), jnp.float32),
        ],
        scratch_shapes=[
            pltpu.VMEM((H + 2, W + 2, Cin), jnp.float32),   # padded image
            pltpu.VMEM((H, W, 9 * Cin), jnp.float32),       # im2col patch
        ],
        compiler_params=pltpu.CompilerParams(
            dimension_semantics=("parallel",),              # both TCs on v7x
            vmem_limit_bytes=vmem_limit),
    )(y, scale, shift, w_taps)


def _bn_residual_relu_kernel(y_ref, x_ref, scale_ref, shift_ref, out_ref):
    # out = relu(bn2_affine(y2) + x), lane-dense (1, H, W*C) blocks.
    out_ref[...] = jnp.maximum(
        y_ref[...] * scale_ref[...] + shift_ref[...] + x_ref[...], 0.0)


def _bn_residual_relu(y2_wc, x_wc, scale_wc, shift_wc):
    B, H, WC = y2_wc.shape
    est = 3 * 2 * (H * WC * 4) + 2 * WC * 4
    vmem_limit = int(min(56 * 2 ** 20, max(32 * 2 ** 20, 2 * est)))
    return pl.pallas_call(
        _bn_residual_relu_kernel,
        grid=(B,),
        in_specs=[
            pl.BlockSpec((1, H, WC), lambda b: (b, 0, 0)),
            pl.BlockSpec((1, H, WC), lambda b: (b, 0, 0)),
            pl.BlockSpec((1, WC), lambda b: (0, 0)),
            pl.BlockSpec((1, WC), lambda b: (0, 0)),
        ],
        out_specs=pl.BlockSpec((1, H, WC), lambda b: (b, 0, 0)),
        out_shape=jax.ShapeDtypeStruct((B, H, WC), jnp.float32),
        compiler_params=pltpu.CompilerParams(
            dimension_semantics=("parallel",),
            vmem_limit_bytes=vmem_limit),
    )(y2_wc, x_wc, scale_wc, shift_wc)


def residual_block_pallas(x_nchw, w1_oihw, g1, b1, w2_oihw, g2, b2):
    """x_nchw: (B, C, H, W) float32; conv weights in PyTorch OIHW layout."""
    B, C, H, W = x_nchw.shape
    Cout = w1_oihw.shape[0]
    assert Cout == C, "identity residual requires in_channels == out_channels"
    # TODO(synk): stride != 1 and the optional `downsample` branch of
    # ResidualBlock are not implemented (unused in the default configuration).
    N = B * H * W

    # NCHW -> NHWC (channels on the lane axis), positions flattened per image.
    x_nhwc = jnp.transpose(x_nchw, (0, 2, 3, 1)).astype(jnp.float32)
    x_rows = x_nhwc.reshape(B, H * W, C)

    # OIHW -> (9*Cin, Cout): tap-major / cin-minor rows, bf16 MXU operand.
    def taps(w):
        cout, cin = w.shape[0], w.shape[1]
        return (jnp.transpose(w, (2, 3, 1, 0))
                .reshape(9 * cin, cout).astype(jnp.bfloat16))

    w1_t, w2_t = taps(w1_oihw), taps(w2_oihw)
    ones_c = jnp.ones((1, C), jnp.float32)
    zeros_c = jnp.zeros((1, C), jnp.float32)

    # ---- pass 1: conv1 + per-image BN1 partial statistics ----
    y1, s1, ss1 = _conv3x3_bn_stats(x_rows, ones_c, zeros_c, w1_t,
                                    H=H, W=W, apply_affine_relu=False)
    mean1 = jnp.sum(s1, axis=(0, 1)) / N
    var1 = jnp.sum(ss1, axis=(0, 1)) / N - mean1 * mean1
    inv1 = g1.astype(jnp.float32) * lax.rsqrt(var1 + EPS)
    scale1 = inv1.reshape(1, Cout)
    shift1 = (b1.astype(jnp.float32) - mean1 * inv1).reshape(1, Cout)

    # ---- pass 2: bn1 affine + ReLU fused into conv2, + BN2 partial stats ----
    y2, s2, ss2 = _conv3x3_bn_stats(y1, scale1, shift1, w2_t,
                                    H=H, W=W, apply_affine_relu=True)
    mean2 = jnp.sum(s2, axis=(0, 1)) / N
    var2 = jnp.sum(ss2, axis=(0, 1)) / N - mean2 * mean2
    inv2 = g2.astype(jnp.float32) * lax.rsqrt(var2 + EPS)
    scale2 = jnp.tile(inv2, W).reshape(1, W * Cout)
    shift2 = jnp.tile(b2.astype(jnp.float32) - mean2 * inv2,
                      W).reshape(1, W * Cout)

    # ---- pass 3: bn2 affine + residual add + ReLU (lane-dense W*C layout) ----
    out_wc = _bn_residual_relu(y2.reshape(B, H, W * Cout),
                               x_nhwc.reshape(B, H, W * Cout),
                               scale2, shift2)

    return jnp.transpose(out_wc.reshape(B, H, W, Cout), (0, 3, 1, 2))


def residual_block_ref(x_nchw, w1, g1, b1, w2, g2, b2):
    """Pure-JAX reference matching the PyTorch training-mode forward."""
    def conv(x, w):
        return lax.conv_general_dilated(
            x, w, window_strides=(1, 1), padding=((1, 1), (1, 1)),
            dimension_numbers=("NCHW", "OIHW", "NCHW"),
            precision=lax.Precision.HIGHEST)

    def bn(x, g, b):
        mean = x.mean(axis=(0, 2, 3), keepdims=True)
        var = ((x - mean) ** 2).mean(axis=(0, 2, 3), keepdims=True)
        return (x - mean) / jnp.sqrt(var + EPS) * g.reshape(1, -1, 1, 1) \
            + b.reshape(1, -1, 1, 1)

    out = jax.nn.relu(bn(conv(x_nchw, w1), g1, b1))
    out = bn(conv(out, w2), g2, b2)
    return jax.nn.relu(out + x_nchw)


if __name__ == "__main__":
    B, C, H, W = 2, 4, 16, 16  # in_channels == out_channels, stride=1, no downsample

    key = jax.random.PRNGKey(0)
    k_x, k_w1, k_w2, k_g1, k_b1, k_g2, k_b2 = jax.random.split(key, 7)

    x = jax.random.normal(k_x, (B, C, H, W), dtype=jnp.float32)
    w1 = 0.1 * jax.random.normal(k_w1, (C, C, 3, 3), dtype=jnp.float32)  # OIHW, bias=False
    w2 = 0.1 * jax.random.normal(k_w2, (C, C, 3, 3), dtype=jnp.float32)
    g1 = 1.0 + 0.1 * jax.random.normal(k_g1, (C,), dtype=jnp.float32)
    b1 = 0.1 * jax.random.normal(k_b1, (C,), dtype=jnp.float32)
    g2 = 1.0 + 0.1 * jax.random.normal(k_g2, (C,), dtype=jnp.float32)
    b2 = 0.1 * jax.random.normal(k_b2, (C,), dtype=jnp.float32)

    out = jax.block_until_ready(residual_block_pallas(x, w1, g1, b1, w2, g2, b2))
    ref = jax.block_until_ready(residual_block_ref(x, w1, g1, b1, w2, g2, b2))

    # bf16 MXU operands (per the performance review) vs. a float32 HIGHEST
    # precision reference: the tolerance accounts for the deliberate bf16
    # rounding of the conv inputs/weights (BN stats and accumulation stay f32).
    np.testing.assert_allclose(np.asarray(out), np.asarray(ref),
                               atol=2e-2, rtol=2e-2)

    print("KERNEL_OK")
</pallas_src>

<mosaic_0001>
module attributes {stable_mosaic.version = 11 : i64} {
  func.func @_conv3x3_stats_kernel(%arg0: i32, %arg1: memref<1x256x4xf32, #tpu.memory_space<vmem>>, %arg2: memref<1x4xf32, #tpu.memory_space<vmem>>, %arg3: memref<1x4xf32, #tpu.memory_space<vmem>>, %arg4: memref<36x4xbf16, #tpu.memory_space<vmem>>, %arg5: memref<1x256x4xf32, #tpu.memory_space<vmem>>, %arg6: memref<1x1x4xf32, #tpu.memory_space<vmem>>, %arg7: memref<1x1x4xf32, #tpu.memory_space<vmem>>, %arg8: memref<18x18x4xf32, #tpu.memory_space<vmem>>, %arg9: memref<16x16x36xf32, #tpu.memory_space<vmem>>) attributes {dimension_semantics = [#tpu.dimension_semantics<parallel>], iteration_bounds = array<i64: 2>, scalar_prefetch = 0 : i64, scratch_operands = 2 : i64, tpu.core_type = #tpu.core_type<tc>, window_params = [{transform_indices = @transform_0, window_bounds = array<i64: 1, 256, 4>}, {pipeline_mode = #tpu.pipeline_mode<synchronous>, transform_indices = @transform_1, window_bounds = array<i64: 1, 4>}, {pipeline_mode = #tpu.pipeline_mode<synchronous>, transform_indices = @transform_2, window_bounds = array<i64: 1, 4>}, {pipeline_mode = #tpu.pipeline_mode<synchronous>, transform_indices = @transform_3, window_bounds = array<i64: 36, 4>}, {transform_indices = @transform_4, window_bounds = array<i64: 1, 256, 4>}, {transform_indices = @transform_5, window_bounds = array<i64: 1, 1, 4>}, {transform_indices = @transform_6, window_bounds = array<i64: 1, 1, 4>}]} {
    %c0 = arith.constant 0 : index
    %c0_0 = arith.constant 0 : index
    %c0_1 = arith.constant 0 : index
    %0 = vector.load %arg1[%c0, %c0_0, %c0_1] : memref<1x256x4xf32, #tpu.memory_space<vmem>>, vector<1x256x4xf32>
    %1 = vector.shape_cast %0 : vector<1x256x4xf32> to vector<256x4xf32>
    %2 = vector.shape_cast %1 : vector<256x4xf32> to vector<16x16x4xf32>
    %cst = arith.constant 0.000000e+00 : f32
    %3 = vector.broadcast %cst : f32 to vector<1x18x4xf32>
    %cst_2 = arith.constant 0.000000e+00 : f32
    %4 = vector.broadcast %cst_2 : f32 to vector<16x1x4xf32>
    %c0_3 = arith.constant 0 : index
    %c0_4 = arith.constant 0 : index
    %c0_5 = arith.constant 0 : index
    %5 = vector.load %arg8[%c0_3, %c0_4, %c0_5] : memref<18x18x4xf32, #tpu.memory_space<vmem>>, vector<1x18x4xf32>
    tpu.vector_store %arg8[%c0_3, %c0_4, %c0_5], %3 {strides = array<i32>} : memref<18x18x4xf32, #tpu.memory_space<vmem>>, vector<1x18x4xf32>,
    %c17 = arith.constant 17 : index
    %c0_6 = arith.constant 0 : index
    %c0_7 = arith.constant 0 : index
    %6 = vector.load %arg8[%c17, %c0_6, %c0_7] : memref<18x18x4xf32, #tpu.memory_space<vmem>>, vector<1x18x4xf32>
    tpu.vector_store %arg8[%c17, %c0_6, %c0_7], %3 {strides = array<i32>} : memref<18x18x4xf32, #tpu.memory_space<vmem>>, vector<1x18x4xf32>,
    %c1 = arith.constant 1 : index
    %c0_8 = arith.constant 0 : index
    %c0_9 = arith.constant 0 : index
    %7 = vector.load %arg8[%c1, %c0_8, %c0_9] : memref<18x18x4xf32, #tpu.memory_space<vmem>>, vector<16x1x4xf32>
    tpu.vector_store %arg8[%c1, %c0_8, %c0_9], %4 {strides = array<i32>} : memref<18x18x4xf32, #tpu.memory_space<vmem>>, vector<16x1x4xf32>,
    %c1_10 = arith.constant 1 : index
    %c17_11 = arith.constant 17 : index
    %c0_12 = arith.constant 0 : index
    %8 = vector.load %arg8[%c1_10, %c17_11, %c0_12] : memref<18x18x4xf32, #tpu.memory_space<vmem>>, vector<16x1x4xf32>
    tpu.vector_store %arg8[%c1_10, %c17_11, %c0_12], %4 {strides = array<i32>} : memref<18x18x4xf32, #tpu.memory_space<vmem>>, vector<16x1x4xf32>,
    %c1_13 = arith.constant 1 : index
    %c1_14 = arith.constant 1 : index
    %c0_15 = arith.constant 0 : index
    %9 = vector.load %arg8[%c1_13, %c1_14, %c0_15] : memref<18x18x4xf32, #tpu.memory_space<vmem>>, vector<16x16x4xf32>
    tpu.vector_store %arg8[%c1_13, %c1_14, %c0_15], %2 {strides = array<i32>} : memref<18x18x4xf32, #tpu.memory_space<vmem>>, vector<16x16x4xf32>,
    %c0_16 = arith.constant 0 : index
    %c0_17 = arith.constant 0 : index
    %c0_18 = arith.constant 0 : index
    %10 = vector.load %arg8[%c0_16, %c0_17, %c0_18] : memref<18x18x4xf32, #tpu.memory_space<vmem>>, vector<16x16x4xf32>
    %c0_19 = arith.constant 0 : index
    %c0_20 = arith.constant 0 : index
    %c0_21 = arith.constant 0 : index
    %11 = vector.load %arg9[%c0_19, %c0_20, %c0_21] : memref<16x16x36xf32, #tpu.memory_space<vmem>>, vector<16x16x4xf32>
    tpu.vector_store %arg9[%c0_19, %c0_20, %c0_21], %10 {strides = array<i32>} : memref<16x16x36xf32, #tpu.memory_space<vmem>>, vector<16x16x4xf32>,
    %c0_22 = arith.constant 0 : index
    %c1_23 = arith.constant 1 : index
    %c0_24 = arith.constant 0 : index
    %12 = vector.load %arg8[%c0_22, %c1_23, %c0_24] : memref<18x18x4xf32, #tpu.memory_space<vmem>>, vector<16x16x4xf32>
    %c0_25 = arith.constant 0 : index
    %c0_26 = arith.constant 0 : index
    %c4 = arith.constant 4 : index
    %13 = vector.load %arg9[%c0_25, %c0_26, %c4] : memref<16x16x36xf32, #tpu.memory_space<vmem>>, vector<16x16x4xf32>
    tpu.vector_store %arg9[%c0_25, %c0_26, %c4], %12 {strides = array<i32>} : memref<16x16x36xf32, #tpu.memory_space<vmem>>, vector<16x16x4xf32>,
    %c0_27 = arith.constant 0 : index
    %c2 = arith.constant 2 : index
    %c0_28 = arith.constant 0 : index
    %14 = vector.load %arg8[%c0_27, %c2, %c0_28] : memref<18x18x4xf32, #tpu.memory_space<vmem>>, vector<16x16x4xf32>
    %c0_29 = arith.constant 0 : index
    %c0_30 = arith.constant 0 : index
    %c8 = arith.constant 8 : index
    %15 = vector.load %arg9[%c0_29, %c0_30, %c8] : memref<16x16x36xf32, #tpu.memory_space<vmem>>, vector<16x16x4xf32>
    tpu.vector_store %arg9[%c0_29, %c0_30, %c8], %14 {strides = array<i32>} : memref<16x16x36xf32, #tpu.memory_space<vmem>>, vector<16x16x4xf32>,
    %c1_31 = arith.constant 1 : index
    %c0_32 = arith.constant 0 : index
    %c0_33 = arith.constant 0 : index
    %16 = vector.load %arg8[%c1_31, %c0_32, %c0_33] : memref<18x18x4xf32, #tpu.memory_space<vmem>>, vector<16x16x4xf32>
    %c0_34 = arith.constant 0 : index
    %c0_35 = arith.constant 0 : index
    %c12 = arith.constant 12 : index
    %17 = vector.load %arg9[%c0_34, %c0_35, %c12] : memref<16x16x36xf32, #tpu.memory_space<vmem>>, vector<16x16x4xf32>
    tpu.vector_store %arg9[%c0_34, %c0_35, %c12], %16 {strides = array<i32>} : memref<16x16x36xf32, #tpu.memory_space<vmem>>, vector<16x16x4xf32>,
    %c1_36 = arith.constant 1 : index
    %c1_37 = arith.constant 1 : index
    %c0_38 = arith.constant 0 : index
    %18 = vector.load %arg8[%c1_36, %c1_37, %c0_38] : memref<18x18x4xf32, #tpu.memory_space<vmem>>, vector<16x16x4xf32>
    %c0_39 = arith.constant 0 : index
    %c0_40 = arith.constant 0 : index
    %c16 = arith.constant 16 : index
    %19 = vector.load %arg9[%c0_39, %c0_40, %c16] : memref<16x16x36xf32, #tpu.memory_space<vmem>>, vector<16x16x4xf32>
    tpu.vector_store %arg9[%c0_39, %c0_40, %c16], %18 {strides = array<i32>} : memref<16x16x36xf32, #tpu.memory_space<vmem>>, vector<16x16x4xf32>,
    %c1_41 = arith.constant 1 : index
    %c2_42 = arith.constant 2 : index
    %c0_43 = arith.constant 0 : index
    %20 = vector.load %arg8[%c1_41, %c2_42, %c0_43] : memref<18x18x4xf32, #tpu.memory_space<vmem>>, vector<16x16x4xf32>
    %c0_44 = arith.constant 0 : index
    %c0_45 = arith.constant 0 : index
    %c20 = arith.constant 20 : index
    %21 = vector.load %arg9[%c0_44, %c0_45, %c20] : memref<16x16x36xf32, #tpu.memory_space<vmem>>, vector<16x16x4xf32>
    tpu.vector_store %arg9[%c0_44, %c0_45, %c20], %20 {strides = array<i32>} : memref<16x16x36xf32, #tpu.memory_space<vmem>>, vector<16x16x4xf32>,
    %c2_46 = arith.constant 2 : index
    %c0_47 = arith.constant 0 : index
    %c0_48 = arith.constant 0 : index
    %22 = vector.load %arg8[%c2_46, %c0_47, %c0_48] : memref<18x18x4xf32, #tpu.memory_space<vmem>>, vector<16x16x4xf32>
    %c0_49 = arith.constant 0 : index
    %c0_50 = arith.constant 0 : index
    %c24 = arith.constant 24 : index
    %23 = vector.load %arg9[%c0_49, %c0_50, %c24] : memref<16x16x36xf32, #tpu.memory_space<vmem>>, vector<16x16x4xf32>
    tpu.vector_store %arg9[%c0_49, %c0_50, %c24], %22 {strides = array<i32>} : memref<16x16x36xf32, #tpu.memory_space<vmem>>, vector<16x16x4xf32>,
    %c2_51 = arith.constant 2 : index
    %c1_52 = arith.constant 1 : index
    %c0_53 = arith.constant 0 : index
    %24 = vector.load %arg8[%c2_51, %c1_52, %c0_53] : memref<18x18x4xf32, #tpu.memory_space<vmem>>, vector<16x16x4xf32>
    %c0_54 = arith.constant 0 : index
    %c0_55 = arith.constant 0 : index
    %c28 = arith.constant 28 : index
    %25 = vector.load %arg9[%c0_54, %c0_55, %c28] : memref<16x16x36xf32, #tpu.memory_space<vmem>>, vector<16x16x4xf32>
    tpu.vector_store %arg9[%c0_54, %c0_55, %c28], %24 {strides = array<i32>} : memref<16x16x36xf32, #tpu.memory_space<vmem>>, vector<16x16x4xf32>,
    %c2_56 = arith.constant 2 : index
    %c2_57 = arith.constant 2 : index
    %c0_58 = arith.constant 0 : index
    %26 = vector.load %arg8[%c2_56, %c2_57, %c0_58] : memref<18x18x4xf32, #tpu.memory_space<vmem>>, vector<16x16x4xf32>
    %c0_59 = arith.constant 0 : index
    %c0_60 = arith.constant 0 : index
    %c32 = arith.constant 32 : index
    %27 = vector.load %arg9[%c0_59, %c0_60, %c32] : memref<16x16x36xf32, #tpu.memory_space<vmem>>, vector<16x16x4xf32>
    tpu.vector_store %arg9[%c0_59, %c0_60, %c32], %26 {strides = array<i32>} : memref<16x16x36xf32, #tpu.memory_space<vmem>>, vector<16x16x4xf32>,
    %c0_61 = arith.constant 0 : index
    %c0_62 = arith.constant 0 : index
    %c0_63 = arith.constant 0 : index
    %28 = vector.load %arg9[%c0_61, %c0_62, %c0_63] : memref<16x16x36xf32, #tpu.memory_space<vmem>>, vector<16x16x36xf32>
    %29 = vector.shape_cast %28 : vector<16x16x36xf32> to vector<256x36xf32>
    %30 = arith.truncf %29 : vector<256x36xf32> to vector<256x36xbf16>
    %c0_64 = arith.constant 0 : index
    %c0_65 = arith.constant 0 : index
    %31 = vector.load %arg4[%c0_64, %c0_65] : memref<36x4xbf16, #tpu.memory_space<vmem>>, vector<36x4xbf16>
    %cst_66 = arith.constant dense<0.000000e+00> : vector<256x4xf32>
    %32 = tpu.matmul %30, %31, %cst_66 {dimension_numbers = #tpu.dot_dimension_numbers<[1], [0], [0], [1], [0, 0, 1, 1], [], []>} : vector<256x36xbf16>, vector<36x4xbf16>, vector<256x4xf32> -> vector<256x4xf32>
    %c0_67 = arith.constant 0 : index
    %c0_68 = arith.constant 0 : index
    %c0_69 = arith.constant 0 : index
    %33 = vector.load %arg5[%c0_67, %c0_68, %c0_69] : memref<1x256x4xf32, #tpu.memory_space<vmem>>, vector<1x256x4xf32>
    %34 = vector.shape_cast %33 : vector<1x256x4xf32> to vector<256x4xf32>
    %35 = vector.shape_cast %32 : vector<256x4xf32> to vector<1x256x4xf32>
    tpu.vector_store %arg5[%c0_67, %c0_68, %c0_69], %35 {strides = array<i32>} : memref<1x256x4xf32, #tpu.memory_space<vmem>>, vector<1x256x4xf32>,
    %cst_70 = arith.constant dense<0.000000e+00> : vector<4xf32>
    %36 = vector.multi_reduction <add>, %32, %cst_70 [0] : vector<256x4xf32> to vector<4xf32>
    %37 = vector.shape_cast %36 : vector<4xf32> to vector<1x4xf32>
    %c0_71 = arith.constant 0 : index
    %c0_72 = arith.constant 0 : index
    %c0_73 = arith.constant 0 : index
    %38 = vector.load %arg6[%c0_71, %c0_72, %c0_73] : memref<1x1x4xf32, #tpu.memory_space<vmem>>, vector<1x1x4xf32>
    %39 = vector.shape_cast %38 : vector<1x1x4xf32> to vector<1x4xf32>
    %40 = vector.shape_cast %37 : vector<1x4xf32> to vector<1x1x4xf32>
    tpu.vector_store %arg6[%c0_71, %c0_72, %c0_73], %40 {strides = array<i32>} : memref<1x1x4xf32, #tpu.memory_space<vmem>>, vector<1x1x4xf32>,
    %41 = arith.mulf %32, %32 : vector<256x4xf32>
    %cst_74 = arith.constant dense<0.000000e+00> : vector<4xf32>
    %42 = vector.multi_reduction <add>, %41, %cst_74 [0] : vector<256x4xf32> to vector<4xf32>
    %43 = vector.shape_cast %42 : vector<4xf32> to vector<1x4xf32>
    %c0_75 = arith.constant 0 : index
    %c0_76 = arith.constant 0 : index
    %c0_77 = arith.constant 0 : index
    %44 = vector.load %arg7[%c0_75, %c0_76, %c0_77] : memref<1x1x4xf32, #tpu.memory_space<vmem>>, vector<1x1x4xf32>
    %45 = vector.shape_cast %44 : vector<1x1x4xf32> to vector<1x4xf32>
    %46 = vector.shape_cast %43 : vector<1x4xf32> to vector<1x1x4xf32>
    tpu.vector_store %arg7[%c0_75, %c0_76, %c0_77], %46 {strides = array<i32>} : memref<1x1x4xf32, #tpu.memory_space<vmem>>, vector<1x1x4xf32>,
    return
  }
  func.func @transform_0(%arg0: i32) -> (i32, i32, i32) {
    %c0_i32 = arith.constant 0 : i32
    %c0_i32_0 = arith.constant 0 : i32
    %c0_i32_1 = arith.constant 0 : i32
    return %arg0, %c0_i32, %c0_i32_0 : i32, i32, i32
  }
  func.func @transform_1(%arg0: i32) -> (i32, i32) {
    %c0_i32 = arith.constant 0 : i32
    %c0_i32_0 = arith.constant 0 : i32
    %c0_i32_1 = arith.constant 0 : i32
    return %c0_i32, %c0_i32_0 : i32, i32
  }
  func.func @transform_2(%arg0: i32) -> (i32, i32) {
    %c0_i32 = arith.constant 0 : i32
    %c0_i32_0 = arith.constant 0 : i32
    %c0_i32_1 = arith.constant 0 : i32
    return %c0_i32, %c0_i32_0 : i32, i32
  }
  func.func @transform_3(%arg0: i32) -> (i32, i32) {
    %c0_i32 = arith.constant 0 : i32
    %c0_i32_0 = arith.constant 0 : i32
    %c0_i32_1 = arith.constant 0 : i32
    return %c0_i32, %c0_i32_0 : i32, i32
  }
  func.func @transform_4(%arg0: i32) -> (i32, i32, i32) {
    %c0_i32 = arith.constant 0 : i32
    %c0_i32_0 = arith.constant 0 : i32
    %c0_i32_1 = arith.constant 0 : i32
    return %arg0, %c0_i32, %c0_i32_0 : i32, i32, i32
  }
  func.func @transform_5(%arg0: i32) -> (i32, i32, i32) {
    %c0_i32 = arith.constant 0 : i32
    %c0_i32_0 = arith.constant 0 : i32
    %c0_i32_1 = arith.constant 0 : i32
    return %arg0, %c0_i32, %c0_i32_0 : i32, i32, i32
  }
  func.func @transform_6(%arg0: i32) -> (i32, i32, i32) {
    %c0_i32 = arith.constant 0 : i32
    %c0_i32_0 = arith.constant 0 : i32
    %c0_i32_1 = arith.constant 0 : i32
    return %arg0, %c0_i32, %c0_i32_0 : i32, i32, i32
  }
}

</mosaic_0001>

<bundles_post_ra>
// kernel: tpu_custom_call.1
= control target key start
LH: loop header
LB: loop body
LE: loop exit
PB: predicated region body
PF: predicated region fallthrough
CT: control target
= control target key end

     0   :  { %12 = vsyncpa [#allocation5], 0  ;;  %s4120_s0 = inlined_call_operand.vmem [shape: f32[2,256,4], index: 0, kind: input, shape index: {}]   ;;  %s4121_s1 = inlined_call_operand.vmem [shape: f32[1,4], index: 1, kind: input, shape index: {}]   ;;  %s4122_s2 = inlined_call_operand.vmem [shape: f32[1,4], index: 2, kind: input, shape index: {}]   ;;  %s4123_s3 = inlined_call_operand.vmem [shape: bf16[36,4], index: 3, kind: input, shape index: {}]   ;;  %s4124_s4 = inlined_call_operand.vmem [shape: f32[2,256,4], index: 4, kind: output, shape index: {0}]   ;;  %s4125_s5 = inlined_call_operand.hbm [shape: f32[2,1,4], index: 5, kind: output, shape index: {1}]   ;;  %s4126_s6 = inlined_call_operand.hbm [shape: f32[2,1,4], index: 6, kind: output, shape index: {2}]  }
   0x1   :  { %14 = vsyncpa [#allocation5 + $0x1], 0 }
   0x2   :  { %15 = vsyncpa [#allocation7], 0 }
   0x3   :  { %17 = vsyncpa [#allocation7 + $0x1], 0  ;;  %s2916_s1 = smov 0   ;;  %s2918_s21 = smov 0  }
   0x4   :  { %s2920_s2 = smov 0   ;;  %s2922_s22 = smov 0  }
   0x5 LB: > { %s2937_s23 = sadd.s32 4294967295, %s2868_s22   ;;  %s2620_s24 = sadd.s32 4294967294, %s2868_s22   ;;  %s2868_s22 = sphi %s2922_s22, %s4132_s22   ;;  %s2864_s2 = sphi %s2920_s2, %s4131_s2   ;;  %s2860_s21 = sphi %s2918_s21, %s4130_s21   ;;  %s2856_s1 = sphi %s2916_s1, %s4129_s1  }
   0x6   : > { %s2941_s25 = sadd.s32 1, %s2868_s22   ;;  %s145_s26 = sadd.s32 1, %s2864_s2 }
   0x7   : > { %s142_s27 = ssub.s32 %s2868_s22, %s2941_s25  ;;  %p155_p0 = scmp.ne.s32.totalorder %s2864_s2, %s2860_s21 }
   0x8   : > { %p143_p1 = scmp.eq.s32.totalorder %s142_s27, 0  ;;  %p156_p2 = scmp.eq.s32.totalorder %s2937_s23, 1 }
   0x9   : > { %p161_p3 = scmp.ne.s32.totalorder %s2860_s21, %s2856_s1  ;;  %p162_p4 = scmp.eq.s32.totalorder %s2620_s24, 1 }
   0xa   : > { %s2952_s28 = scalar_select %p143_p1, %s2864_s2, %s145_s26  }
   0xb   : > { %p2954_p5 = por %p156_p2, %p155_p0  ;;  %p2958_p6 = por %p162_p4, %p161_p3 }
   0xc   : > { %p2623_p7 = scmp.ge.s32.totalorder %s2868_s22, 1  ;;  %p223_p8 = scmp.lt.s32.totalorder %s2868_s22, 3 }
   0xe   : > { %p224_p9 = pnand %p2623_p7, %p223_p8 }
   0xf   : > { %vm304_vm0 = vcmask (!%p224_p9), 31744   ;;  %vm307_vm1 = vcmask (!%p224_p9), 25600   ;;  %p261_p10 = scmp.lt.s32.totalorder (!%p224_p9), %s2937_s23, 1  ;;  %vm314_vm2 = vcmask (!%p224_p9), 24576   ;;  %v2870_v0 = vmov (!%p224_p9), 0.0   ;;  %s2871_s12 = smov (!%p224_p9), 4  }
  0x10   : > { %227 = sbr.rel (%p224_p9) target bundleno = 947 (0x3b3), region = 36  ;;  %305 = vst.msk [vmem:[#allocation2] sm:$0xff] (!%p224_p9), %vm304_vm0, %v2870_v0  ;;  %306 = vst.msk [vmem:[#allocation2 + $0x8] sm:$0xff] (!%p224_p9), %vm304_vm0, %v2870_v0  ;;  %s2872_s13 = smov (!%p224_p9), 8   ;;  %vm603_vm3 = vcmask (!%p224_p9), 64544   ;;  %vm796_vm4 = vcmask (!%p224_p9), 97344  }
  0x11   : > { %310 = vst.msk [vmem:[#allocation2 + $0x198] sm:$0xff] (!%p224_p9), %vm304_vm0, %v2870_v0  ;;  %311 = vst.msk [vmem:[#allocation2 + $0x1a0] sm:$0xff] (!%p224_p9), %vm304_vm0, %v2870_v0  ;;  %s2873_s14 = smov (!%p224_p9), 12   ;;  %s2874_s15 = smov (!%p224_p9), 16   ;;  %vm2105_vm5 = vcmask (!%p224_p9), 1041408   ;;  %vm989_vm6 = vcmask (!%p224_p9), 130144  }
  0x12   : > { %308 = vst.msk [vmem:[#allocation2 + $0x10] sm:$0x3] (!%p224_p9), %vm307_vm1, %v2870_v0  ;;  %312 = vst.msk [vmem:[#allocation2 + $0x1a8] sm:$0x3] (!%p224_p9), %vm307_vm1, %v2870_v0  ;;  %s2875_s16 = smov (!%p224_p9), 20   ;;  %s2876_s17 = smov (!%p224_p9), 24  }
  0x13   : > { %331 = vst.msk [vmem:[#allocation2 + $0x29] sm:$0x1] (!%p224_p9), %vm314_vm2, %v2870_v0  ;;  %315 = vst.msk [vmem:[#allocation2 + $0x18] sm:$0x1] (!%p224_p9), %vm314_vm2, %v2870_v0  ;;  %s2877_s20 = smov (!%p224_p9), 28   ;;  %s2878_s10 = smov (!%p224_p9), 32  }
  0x14   : > { %316 = vst.msk [vmem:[#allocation2 + $0x30] sm:$0x1] (!%p224_p9), %vm314_vm2, %v2870_v0  ;;  %317 = vst.msk [vmem:[#allocation2 + $0x48] sm:$0x1] (!%p224_p9), %vm314_vm2, %v2870_v0  ;;  %vm1182_vm7 = vcmask (!%p224_p9), 162944   ;;  %vm1375_vm8 = vcmask (!%p224_p9), 195744  }
  0x15   : > { %318 = vst.msk [vmem:[#allocation2 + $0x60] sm:$0x1] (!%p224_p9), %vm314_vm2, %v2870_v0  ;;  %319 = vst.msk [vmem:[#allocation2 + $0x78] sm:$0x1] (!%p224_p9), %vm314_vm2, %v2870_v0  ;;  %vm1569_vm9 = vcmask (!%p224_p9), 228544   ;;  %vm1762_vm10 = vcmask (!%p224_p9), 261344  }
  0x16   : > { %320 = vst.msk [vmem:[#allocation2 + $0x90] sm:$0x1] (!%p224_p9), %vm314_vm2, %v2870_v0  ;;  %321 = vst.msk [vmem:[#allocation2 + $0xa8] sm:$0x1] (!%p224_p9), %vm314_vm2, %v2870_v0  ;;  %vm1955_vm11 = vcmask (!%p224_p9), 294144   ;;  %vm2056_vm12 = vcmask (!%p224_p9), 293888  }
  0x17   : > { %322 = vst.msk [vmem:[#allocation2 + $0xc0] sm:$0x1] %vm314_vm2, %v2870_v0  ;;  %323 = vst.msk [vmem:[#allocation2 + $0xd8] sm:$0x1] %vm314_vm2, %v2870_v0  ;;  %s3004_s7 = scalar_select %p261_p10, %s2937_s23, 1  ;;  %v443_v7 = vld [vmem:[#allocation2 + $0x1] sm:$0xff] }
  0x18   : > { %324 = vst.msk [vmem:[#allocation2 + $0xf0] sm:$0x1] %vm314_vm2, %v2870_v0  ;;  %325 = vst.msk [vmem:[#allocation2 + $0x108] sm:$0x1] %vm314_vm2, %v2870_v0  ;;  %507 = vrot.lane.b32.xlu0 %v443_v7, %s2871_s12  ;;  %v379_v45 = vld [vmem:[#allocation2] sm:$0xff]  ;;  %v380_v47 = vld [vmem:[#allocation2 + $0x8] sm:$0xff] }
  0x19   : > { %326 = vst.msk [vmem:[#allocation2 + $0x120] sm:$0x1] %vm314_vm2, %v2870_v0  ;;  %327 = vst.msk [vmem:[#allocation2 + $0x138] sm:$0x1] %vm314_vm2, %v2870_v0  ;;  %s2651_s8 = sshll.u32 %s3004_s7, 8  ;;  %v444_v8 = vld [vmem:[#allocation2 + $0x9] sm:$0xff] }
  0x1a   : > { %328 = vst.msk [vmem:[#allocation2 + $0x150] sm:$0x1] %vm314_vm2, %v2870_v0  ;;  %329 = vst.msk [vmem:[#allocation2 + $0x168] sm:$0x1] %vm314_vm2, %v2870_v0  ;;  %s3012_s11 = scalar_lea.vmem %s4120_s0, %s2651_s8  ;;  %s4034_s7 = sand.u32 1, %s2860_s21  }
  0x1b   : > { %330 = vst.msk [vmem:[#allocation2 + $0x180] sm:$0x1] %vm314_vm2, %v2870_v0  ;;  %332 = vst.msk [vmem:[#allocation2 + $0x41] sm:$0x1] %vm314_vm2, %v2870_v0  ;;  %v272_v1 = vld [vmem:[%s3012_s11] sm:$0xff]  ;;  %v274_v2 = vld [vmem:[%s3012_s11 + $0x10] sm:$0xff] }
  0x1c   : > { %333 = vst.msk [vmem:[#allocation2 + $0x59] sm:$0x1] %vm314_vm2, %v2870_v0  ;;  %334 = vst.msk [vmem:[#allocation2 + $0x71] sm:$0x1] %vm314_vm2, %v2870_v0  ;;  %v273_v3 = vld [vmem:[%s3012_s11 + $0x8] sm:$0xff]  ;;  %v276_v4 = vld [vmem:[%s3012_s11 + $0x20] sm:$0xff]  ;;  %509 = vrot.lane.b32.xlu0 %v444_v8, %s2871_s12 }
  0x1d   : > { %335 = vst.msk [vmem:[#allocation2 + $0x89] sm:$0x1] %vm314_vm2, %v2870_v0  ;;  %336 = vst.msk [vmem:[#allocation2 + $0xa1] sm:$0x1] %vm314_vm2, %v2870_v0  ;;  %v275_v5 = vld [vmem:[%s3012_s11 + $0x18] sm:$0xff]  ;;  %v278_v6 = vld [vmem:[%s3012_s11 + $0x30] sm:$0xff] }
  0x1e   : > { %337 = vst.msk [vmem:[#allocation2 + $0xb9] sm:$0x1] %vm314_vm2, %v2870_v0  ;;  %338 = vst.msk [vmem:[#allocation2 + $0xd1] sm:$0x1] %vm314_vm2, %v2870_v0  ;;  %v277_v9 = vld [vmem:[%s3012_s11 + $0x28] sm:$0xff]  ;;  %v280_v10 = vld [vmem:[%s3012_s11 + $0x40] sm:$0xff] }
  0x1f   : > { %339 = vst.msk [vmem:[#allocation2 + $0xe9] sm:$0x1] %vm314_vm2, %v2870_v0  ;;  %340 = vst.msk [vmem:[#allocation2 + $0x101] sm:$0x1] %vm314_vm2, %v2870_v0  ;;  %v279_v11 = vld [vmem:[%s3012_s11 + $0x38] sm:$0xff]  ;;  %v282_v12 = vld [vmem:[%s3012_s11 + $0x50] sm:$0xff] }
  0x20   : > { %341 = vst.msk [vmem:[#allocation2 + $0x119] sm:$0x1] %vm314_vm2, %v2870_v0  ;;  %342 = vst.msk [vmem:[#allocation2 + $0x131] sm:$0x1] %vm314_vm2, %v2870_v0  ;;  %v281_v13 = vld [vmem:[%s3012_s11 + $0x48] sm:$0xff]  ;;  %v284_v14 = vld [vmem:[%s3012_s11 + $0x60] sm:$0xff] }
  0x21   : > { %343 = vst.msk [vmem:[#allocation2 + $0x149] sm:$0x1] %vm314_vm2, %v2870_v0  ;;  %344 = vst.msk [vmem:[#allocation2 + $0x161] sm:$0x1] %vm314_vm2, %v2870_v0  ;;  %v283_v15 = vld [vmem:[%s3012_s11 + $0x58] sm:$0xff]  ;;  %v286_v16 = vld [vmem:[%s3012_s11 + $0x70] sm:$0xff] }
  0x22   : > { %345 = vst.msk [vmem:[#allocation2 + $0x179] sm:$0x1] %vm314_vm2, %v2870_v0  ;;  %346 = vst.msk [vmem:[#allocation2 + $0x191] sm:$0x1] %vm314_vm2, %v2870_v0  ;;  %v285_v17 = vld [vmem:[%s3012_s11 + $0x68] sm:$0xff]  ;;  %v288_v18 = vld [vmem:[%s3012_s11 + $0x80] sm:$0xff] }
  0x23   : > { %347 = vst.msk [vmem:[#allocation2 + $0x19] sm:$0xff] %vm304_vm0, %v272_v1  ;;  %349 = vst.msk [vmem:[#allocation2 + $0x31] sm:$0xff] %vm304_vm0, %v274_v2  ;;  %v287_v19 = vld [vmem:[%s3012_s11 + $0x78] sm:$0xff]  ;;  %v290_v20 = vld [vmem:[%s3012_s11 + $0x90] sm:$0xff]  ;;  %s2480_s27 = scalar_lea.sflag [#allocation5], %s4034_s7 }
  0x24   : > { %348 = vst.msk [vmem:[#allocation2 + $0x21] sm:$0xff] %vm304_vm0, %v273_v3  ;;  %351 = vst.msk [vmem:[#allocation2 + $0x49] sm:$0xff] %vm304_vm0, %v276_v4  ;;  %v289_v21 = vld [vmem:[%s3012_s11 + $0x88] sm:$0xff]  ;;  %v292_v22 = vld [vmem:[%s3012_s11 + $0xa0] sm:$0xff] }
  0x25   : > { %350 = vst.msk [vmem:[#allocation2 + $0x39] sm:$0xff] %vm304_vm0, %v275_v5  ;;  %353 = vst.msk [vmem:[#allocation2 + $0x61] sm:$0xff] %vm304_vm0, %v278_v6  ;;  %v291_v23 = vld [vmem:[%s3012_s11 + $0x98] sm:$0xff]  ;;  %v294_v24 = vld [vmem:[%s3012_s11 + $0xb0] sm:$0xff] }
  0x26   : > { %352 = vst.msk [vmem:[#allocation2 + $0x51] sm:$0xff] %vm304_vm0, %v277_v9  ;;  %355 = vst.msk [vmem:[#allocation2 + $0x79] sm:$0xff] %vm304_vm0, %v280_v10  ;;  %v293_v28 = vld [vmem:[%s3012_s11 + $0xa8] sm:$0xff]  ;;  %v296_v29 = vld [vmem:[%s3012_s11 + $0xc0] sm:$0xff] }
  0x27   : > { %354 = vst.msk [vmem:[#allocation2 + $0x69] sm:$0xff] %vm304_vm0, %v279_v11  ;;  %357 = vst.msk [vmem:[#allocation2 + $0x91] sm:$0xff] %vm304_vm0, %v282_v12  ;;  %v295_v33 = vld [vmem:[%s3012_s11 + $0xb8] sm:$0xff]  ;;  %v298_v34 = vld [vmem:[%s3012_s11 + $0xd0] sm:$0xff] }
  0x28   : > { %356 = vst.msk [vmem:[#allocation2 + $0x81] sm:$0xff] %vm304_vm0, %v281_v13  ;;  %359 = vst.msk [vmem:[#allocation2 + $0xa9] sm:$0xff] %vm304_vm0, %v284_v14  ;;  %v297_v35 = vld [vmem:[%s3012_s11 + $0xc8] sm:$0xff]  ;;  %v300_v36 = vld [vmem:[%s3012_s11 + $0xe0] sm:$0xff] }
  0x29   : > { %358 = vst.msk [vmem:[#allocation2 + $0x99] sm:$0xff] %vm304_vm0, %v283_v15  ;;  %361 = vst.msk [vmem:[#allocation2 + $0xc1] sm:$0xff] %vm304_vm0, %v286_v16  ;;  %v299_v37 = vld [vmem:[%s3012_s11 + $0xd8] sm:$0xff]  ;;  %v301_v39 = vld [vmem:[%s3012_s11 + $0xe8] sm:$0xff] }
  0x2a   : > { %360 = vst.msk [vmem:[#allocation2 + $0xb1] sm:$0xff] %vm304_vm0, %v285_v17  ;;  %363 = vst.msk [vmem:[#allocation2 + $0xd9] sm:$0xff] %vm304_vm0, %v288_v18  ;;  %v3057_v25 = vld [vmem:[#allocation2 + $0x19] sm:$0xff]  ;;  %v3059_v26 = vld [vmem:[#allocation2 + $0x31] sm:$0xff] }
  0x2b   : > { %362 = vst.msk [vmem:[#allocation2 + $0xc9] sm:$0xff] %vm304_vm0, %v287_v19  ;;  %365 = vst.msk [vmem:[#allocation2 + $0xf1] sm:$0xff] %vm304_vm0, %v290_v20  ;;  %511 = vrot.lane.b32.xlu1 %v3057_v25, %s2871_s12  ;;  %v3066_v27 = vld [vmem:[#allocation2 + $0x21] sm:$0xff]  ;;  %515 = vrot.lane.b32.xlu0 %v3059_v26, %s2871_s12  ;;  %v3074_v30 = vld [vmem:[#allocation2 + $0x49] sm:$0xff] }
  0x2c   : > { %364 = vst.msk [vmem:[#allocation2 + $0xe1] sm:$0xff] %vm304_vm0, %v289_v21  ;;  %367 = vst.msk [vmem:[#allocation2 + $0x109] sm:$0xff] %vm304_vm0, %v292_v22  ;;  %v3078_v31 = vld [vmem:[#allocation2 + $0x39] sm:$0xff]  ;;  %v3082_v32 = vld [vmem:[#allocation2 + $0x61] sm:$0xff] }
  0x2d   : > { %366 = vst.msk [vmem:[#allocation2 + $0xf9] sm:$0xff] %vm304_vm0, %v291_v23  ;;  %369 = vst.msk [vmem:[#allocation2 + $0x121] sm:$0xff] %vm304_vm0, %v294_v24  ;;  %v3094_v38 = vld [vmem:[#allocation2 + $0x51] sm:$0xff]  ;;  %v3102_v40 = vld [vmem:[#allocation2 + $0x79] sm:$0xff] }
  0x2e   : > { %368 = vst.msk [vmem:[#allocation2 + $0x111] sm:$0xff] %vm304_vm0, %v293_v28  ;;  %371 = vst.msk [vmem:[#allocation2 + $0x139] sm:$0xff] %vm304_vm0, %v296_v29  ;;  %v3106_v41 = vld [vmem:[#allocation2 + $0x69] sm:$0xff]  ;;  %v3110_v42 = vld [vmem:[#allocation2 + $0x91] sm:$0xff] }
  0x2f   : > { %513 = vrot.lane.b32.xlu1 %v3066_v27, %s2871_s12  ;;  %519 = vrot.lane.b32.xlu0 %v3074_v30, %s2871_s12  ;;  %370 = vst.msk [vmem:[#allocation2 + $0x129] sm:$0xff] %vm304_vm0, %v295_v33  ;;  %373 = vst.msk [vmem:[#allocation2 + $0x151] sm:$0xff] %vm304_vm0, %v298_v34  ;;  %v3114_v43 = vld [vmem:[#allocation2 + $0x81] sm:$0xff]  ;;  %v457_v44 = vld [vmem:[#allocation2 + $0xa9] sm:$0xff] }
  0x30   : > { %372 = vst.msk [vmem:[#allocation2 + $0x141] sm:$0xff] %vm304_vm0, %v297_v35  ;;  %375 = vst.msk [vmem:[#allocation2 + $0x169] sm:$0xff] %vm304_vm0, %v300_v36  ;;  %v3120_v46 = vld [vmem:[#allocation2 + $0x99] sm:$0xff]  ;;  %v3129_v49 = vld [vmem:[#allocation2 + $0x30] sm:$0xff] }
  0x31   : > { %374 = vst.msk [vmem:[#allocation2 + $0x159] sm:$0xff] %vm304_vm0, %v299_v37  ;;  %376 = vst.msk [vmem:[#allocation2 + $0x171] sm:$0xff] %vm304_vm0, %v301_v39  ;;  %v3123_v48 = vld [vmem:[#allocation2 + $0x18] sm:$0xff]  ;;  %v3131_v50 = vld [vmem:[#allocation2 + $0x20] sm:$0xff] }
  0x32   : > { %411 = vst.msk [vmem:[#allocation3] sm:$0xff] %vm304_vm0, %v379_v45  ;;  %412 = vst.msk [vmem:[#allocation3 + $0x8] sm:$0xff] %vm304_vm0, %v380_v47  ;;  %v459_v51 = vld [vmem:[#allocation2 + $0xc1] sm:$0xff]  ;;  %v458_v53 = vld [vmem:[#allocation2 + $0xb1] sm:$0xff] }
  0x33   : > { %517 = vrot.lane.b32.xlu1 %v3078_v31, %s2871_s12  ;;  %523 = vrot.lane.b32.xlu0 %v3082_v32, %s2871_s12  ;;  %413 = vst.msk [vmem:[#allocation3 + $0x10] sm:$0xff] %vm304_vm0, %v3123_v48  ;;  %415 = vst.msk [vmem:[#allocation3 + $0x20] sm:$0xff] %vm304_vm0, %v3129_v49  ;;  %v3137_v52 = vld [vmem:[#allocation2 + $0x48] sm:$0xff]  ;;  %v3143_v54 = vld [vmem:[#allocation2 + $0x38] sm:$0xff] }
  0x34   : > { %414 = vst.msk [vmem:[#allocation3 + $0x18] sm:$0xff] %vm304_vm0, %v3131_v50  ;;  %417 = vst.msk [vmem:[#allocation3 + $0x30] sm:$0xff] %vm304_vm0, %v3137_v52  ;;  %v3145_v55 = vld [vmem:[#allocation2 + $0x60] sm:$0xff]  ;;  %v3151_v57 = vld [vmem:[#allocation2 + $0x50] sm:$0xff] }
  0x35   : > { %v461_v56 = vld [vmem:[#allocation2 + $0xd9] sm:$0xff]  ;;  %416 = vst.msk [vmem:[#allocation3 + $0x28] sm:$0xff] %vm304_vm0, %v3143_v54  ;;  %419 = vst.msk [vmem:[#allocation3 + $0x40] sm:$0xff] %vm304_vm0, %v3145_v55  ;;  %v3155_v59 = vld [vmem:[#allocation2 + $0x68] sm:$0xff] }
  0x36   : > { %v3153_v58 = vld [vmem:[#allocation2 + $0x78] sm:$0xff]  ;;  %418 = vst.msk [vmem:[#allocation3 + $0x38] sm:$0xff] %vm304_vm0, %v3151_v57  ;;  %420 = vst.msk [vmem:[#allocation3 + $0x48] sm:$0xff] %vm304_vm0, %v3155_v59  ;;  %v3164_v60 = vld [vmem:[#allocation2 + $0x90] sm:$0xff] }
  0x37   : > { %521 = vrot.lane.b32.xlu1 %v3094_v38, %s2871_s12  ;;  %527 = vrot.lane.b32.xlu0 %v3102_v40, %s2871_s12  ;;  %421 = vst.msk [vmem:[#allocation3 + $0x50] sm:$0xff] %vm304_vm0, %v3153_v58  ;;  %v3166_v61 = vld [vmem:[#allocation2 + $0x80] sm:$0xff]  ;;  %v3168_v62 = vld [vmem:[#allocation2 + $0xa8] sm:$0xff]  ;;  %423 = vst.msk [vmem:[#allocation3 + $0x60] sm:$0xff] %vm304_vm0, %v3164_v60 }
  0x38   : > { %v460_v63 = vld [vmem:[#allocation2 + $0xc9] sm:$0xff]  ;;  %422 = vst.msk [vmem:[#allocation3 + $0x58] sm:$0xff] %vm304_vm0, %v3166_v61  ;;  %425 = vst.msk [vmem:[#allocation3 + $0x70] sm:$0xff] %vm304_vm0, %v3168_v62  ;;  %v3176_v0 = vld [vmem:[#allocation2 + $0x98] sm:$0xff] }
  0x39   : > { %v3178_v1 = vld [vmem:[#allocation2 + $0xc0] sm:$0xff]  ;;  %v3180_v2 = vld [vmem:[#allocation2 + $0xb0] sm:$0xff]  ;;  %424 = vst.msk [vmem:[#allocation3 + $0x68] sm:$0xff] %vm304_vm0, %v3176_v0  ;;  %v3189_v3 = vld [vmem:[#allocation2 + $0xd8] sm:$0xff] }
  0x3a   : > { %427 = vst.msk [vmem:[#allocation3 + $0x80] sm:$0xff] %vm304_vm0, %v3178_v1  ;;  %426 = vst.msk [vmem:[#allocation3 + $0x78] sm:$0xff] %vm304_vm0, %v3180_v2  ;;  %v3191_v4 = vld [vmem:[#allocation2 + $0xc8] sm:$0xff]  ;;  %v3193_v5 = vld [vmem:[#allocation2 + $0xf0] sm:$0xff] }
  0x3b   : > { %525 = vrot.lane.b32.xlu1 %v3106_v41, %s2871_s12  ;;  %531 = vrot.lane.b32.xlu0 %v3110_v42, %s2871_s12  ;;  %429 = vst.msk [vmem:[#allocation3 + $0x90] sm:$0xff] %vm304_vm0, %v3189_v3  ;;  %428 = vst.msk [vmem:[#allocation3 + $0x88] sm:$0xff] %vm304_vm0, %v3191_v4  ;;  %v3201_v6 = vld [vmem:[#allocation2 + $0xe0] sm:$0xff]  ;;  %v3203_v7 = vld [vmem:[#allocation2 + $0x108] sm:$0xff] }
  0x3c   : > { %431 = vst.msk [vmem:[#allocation3 + $0xa0] sm:$0xff] %vm304_vm0, %v3193_v5  ;;  %v3205_v8 = vld [vmem:[#allocation2 + $0xf8] sm:$0xff]  ;;  %430 = vst.msk [vmem:[#allocation3 + $0x98] sm:$0xff] %vm304_vm0, %v3201_v6  ;;  %v3214_v9 = vld [vmem:[#allocation2 + $0x120] sm:$0xff] }
  0x3d   : > { %433 = vst.msk [vmem:[#allocation3 + $0xb0] sm:$0xff] %vm304_vm0, %v3203_v7  ;;  %432 = vst.msk [vmem:[#allocation3 + $0xa8] sm:$0xff] %vm304_vm0, %v3205_v8  ;;  %v3216_v10 = vld [vmem:[#allocation2 + $0x110] sm:$0xff]  ;;  %v405_v12 = vld [vmem:[#allocation2 + $0x138] sm:$0xff] }
  0x3e   : > { %v463_v11 = vld [vmem:[#allocation2 + $0xf1] sm:$0xff]  ;;  %435 = vst.msk [vmem:[#allocation3 + $0xc0] sm:$0xff] %vm304_vm0, %v3214_v9  ;;  %434 = vst.msk [vmem:[#allocation3 + $0xb8] sm:$0xff] %vm304_vm0, %v3216_v10  ;;  %v462_v13 = vld [vmem:[#allocation2 + $0xe1] sm:$0xff] }
  0x3f   : > { %529 = vrot.lane.b32.xlu1 %v3114_v43, %s2871_s12  ;;  %535 = vrot.lane.b32.xlu0 %v457_v44, %s2871_s12  ;;  %437 = vst.msk [vmem:[#allocation3 + $0xd0] sm:$0xff] %vm304_vm0, %v405_v12  ;;  %v3224_v14 = vld [vmem:[#allocation2 + $0x128] sm:$0xff]  ;;  %v407_v16 = vld [vmem:[#allocation2 + $0x150] sm:$0xff]  ;;  %v464_v17 = vld [vmem:[#allocation2 + $0xf9] sm:$0xff] }
  0x40   : > { %436 = vst.msk [vmem:[#allocation3 + $0xc8] sm:$0xff] %vm304_vm0, %v3224_v14  ;;  %v465_v15 = vld [vmem:[#allocation2 + $0x109] sm:$0xff]  ;;  %439 = vst.msk [vmem:[#allocation3 + $0xe0] sm:$0xff] %vm304_vm0, %v407_v16  ;;  %v406_v18 = vld [vmem:[#allocation2 + $0x140] sm:$0xff] }
  0x41   : > { %438 = vst.msk [vmem:[#allocation3 + $0xd8] sm:$0xff] %vm304_vm0, %v406_v18  ;;  %v467_v19 = vld [vmem:[#allocation2 + $0x121] sm:$0xff]  ;;  %v466_v21 = vld [vmem:[#allocation2 + $0x111] sm:$0xff]  ;;  %v469_v23 = vld [vmem:[#allocation2 + $0x139] sm:$0xff] }
  0x42   : > { %v409_v20 = vld [vmem:[#allocation2 + $0x168] sm:$0xff]  ;;  %v408_v22 = vld [vmem:[#allocation2 + $0x158] sm:$0xff]  ;;  %v410_v28 = vld [vmem:[#allocation2 + $0x170] sm:$0xff] }
  0x43   : > { %533 = vrot.lane.b32.xlu1 %v3120_v46, %s2871_s12  ;;  %539 = vrot.lane.b32.xlu0 %v459_v51, %s2871_s12  ;;  %441 = vst.msk [vmem:[#allocation3 + $0xf0] sm:$0xff] %vm304_vm0, %v409_v20  ;;  %440 = vst.msk [vmem:[#allocation3 + $0xe8] sm:$0xff] %vm304_vm0, %v408_v22  ;;  %v468_v24 = vld [vmem:[#allocation2 + $0x129] sm:$0xff]  ;;  %v471_v29 = vld [vmem:[#allocation2 + $0x151] sm:$0xff] }
  0x44   : > { %442 = vst.msk [vmem:[#allocation3 + $0xf8] sm:$0xff] %vm304_vm0, %v410_v28  ;;  %v470_v33 = vld [vmem:[#allocation2 + $0x141] sm:$0xff]  ;;  %v473_v34 = vld [vmem:[#allocation2 + $0x169] sm:$0xff]  ;;  %v472_v35 = vld [vmem:[#allocation2 + $0x159] sm:$0xff] }
  0x45   : > { %v636_v36 = vld [vmem:[#allocation2 + $0x2] sm:$0xff]  ;;  %v474_v37 = vld [vmem:[#allocation2 + $0x171] sm:$0xff]  ;;  %v3246_v39 = vld [vmem:[#allocation2 + $0x1a] sm:$0xff] }
  0x46   : > { %v637_v44 = vld [vmem:[#allocation2 + $0xa] sm:$0xff]  ;;  %v3251_v45 = vld [vmem:[#allocation2 + $0x32] sm:$0xff]  ;;  %v3254_v47 = vld [vmem:[#allocation2 + $0x22] sm:$0xff] }
  0x47   : > { %537 = vrot.lane.b32.xlu1 %v458_v53, %s2871_s12  ;;  %543 = vrot.lane.b32.xlu0 %v461_v56, %s2871_s12  ;;  %v3258_v51 = vld [vmem:[#allocation2 + $0x4a] sm:$0xff]  ;;  %v3262_v53 = vld [vmem:[#allocation2 + $0x3a] sm:$0xff]  ;;  %v3266_v56 = vld [vmem:[#allocation2 + $0x62] sm:$0xff] }
  0x48   : > { %v3278_v12 = vld [vmem:[#allocation2 + $0x6a] sm:$0xff]  ;;  %v3298_v18 = vld [vmem:[#allocation2 + $0xc2] sm:$0xff]  ;;  %v654_v20 = vld [vmem:[#allocation2 + $0xda] sm:$0xff] }
  0x49   : > { %v3290_v16 = vld [vmem:[#allocation2 + $0xaa] sm:$0xff]  ;;  %v656_v22 = vld [vmem:[#allocation2 + $0xf2] sm:$0xff]  ;;  %v657_v28 = vld [vmem:[#allocation2 + $0xfa] sm:$0xff] }
  0x4b   : > { %541 = vrot.lane.b32.xlu1 %v460_v63, %s2871_s12  ;;  %547 = vrot.lane.b32.xlu0 %v463_v11, %s2871_s12  ;;  %v3270_v63 = vld [vmem:[#allocation2 + $0x52] sm:$0xff]  ;;  %v3274_v11 = vld [vmem:[#allocation2 + $0x7a] sm:$0xff] }
  0x4f   : > { %545 = vrot.lane.b32.xlu1 %v462_v13, %s2871_s12  ;;  %551 = vrot.lane.b32.xlu0 %v465_v15, %s2871_s12  ;;  %v3282_v13 = vld [vmem:[#allocation2 + $0x92] sm:$0xff]  ;;  %v3286_v15 = vld [vmem:[#allocation2 + $0x82] sm:$0xff] }
  0x53   : > { %549 = vrot.lane.b32.xlu1 %v464_v17, %s2871_s12  ;;  %555 = vrot.lane.b32.xlu0 %v467_v19, %s2871_s12  ;;  %v3294_v17 = vld [vmem:[#allocation2 + $0x9a] sm:$0xff]  ;;  %v3302_v19 = vld [vmem:[#allocation2 + $0xb2] sm:$0xff] }
  0x57   : > { %553 = vrot.lane.b32.xlu1 %v466_v21, %s2871_s12  ;;  %559 = vrot.lane.b32.xlu0 %v469_v23, %s2871_s12  ;;  %v3308_v21 = vld [vmem:[#allocation2 + $0xca] sm:$0xff]  ;;  %v655_v23 = vld [vmem:[#allocation2 + $0xe2] sm:$0xff] }
  0x5b   : > { %557 = vrot.lane.b32.xlu1 %v468_v24, %s2871_s12  ;;  %563 = vrot.lane.b32.xlu0 %v471_v29, %s2871_s12  ;;  %v658_v24 = vld [vmem:[#allocation2 + $0x10a] sm:$0xff]  ;;  %v660_v29 = vld [vmem:[#allocation2 + $0x122] sm:$0xff] }
  0x5f   : > { %561 = vrot.lane.b32.xlu1 %v470_v33, %s2871_s12  ;;  %567 = vrot.lane.b32.xlu0 %v473_v34, %s2871_s12  ;;  %v659_v33 = vld [vmem:[#allocation2 + $0x112] sm:$0xff]  ;;  %v662_v34 = vld [vmem:[#allocation2 + $0x13a] sm:$0xff] }
  0x63   : > { %565 = vrot.lane.b32.xlu1 %v472_v35, %s2871_s12  ;;  %700 = vrot.lane.b32.xlu0 %v636_v36, %s2872_s13  ;;  %v661_v36 = vld [vmem:[#allocation2 + $0x12a] sm:$0xff] }
  0x67   : > { %569 = vrot.lane.b32.xlu1 %v474_v37, %s2871_s12  ;;  %704 = vrot.lane.b32.xlu0 %v3246_v39, %s2872_s13  ;;  %v664_v37 = vld [vmem:[#allocation2 + $0x152] sm:$0xff] }
  0x6b   : > { %702 = vrot.lane.b32.xlu1 %v637_v44, %s2872_s13  ;;  %708 = vrot.lane.b32.xlu0 %v3251_v45, %s2872_s13 }
  0x6f   : > { %706 = vrot.lane.b32.xlu1 %v3254_v47, %s2872_s13  ;;  %712 = vrot.lane.b32.xlu0 %v3258_v51, %s2872_s13 }
  0x73   : > { %710 = vrot.lane.b32.xlu1 %v3262_v53, %s2872_s13  ;;  %716 = vrot.lane.b32.xlu0 %v3266_v56, %s2872_s13 }
  0x77   : > { %714 = vrot.lane.b32.xlu1 %v3270_v63, %s2872_s13  ;;  %720 = vrot.lane.b32.xlu0 %v3274_v11, %s2872_s13 }
  0x7b   : > { %718 = vrot.lane.b32.xlu1 %v3278_v12, %s2872_s13  ;;  %724 = vrot.lane.b32.xlu0 %v3282_v13, %s2872_s13 }
  0x7f   : > { %722 = vrot.lane.b32.xlu1 %v3286_v15, %s2872_s13  ;;  %728 = vrot.lane.b32.xlu0 %v3290_v16, %s2872_s13 }
  0x83   : > { %726 = vrot.lane.b32.xlu1 %v3294_v17, %s2872_s13  ;;  %732 = vrot.lane.b32.xlu0 %v3298_v18, %s2872_s13 }
  0x87   : > { %730 = vrot.lane.b32.xlu1 %v3302_v19, %s2872_s13  ;;  %736 = vrot.lane.b32.xlu0 %v654_v20, %s2872_s13  ;;  %v663_v20 = vld [vmem:[#allocation2 + $0x142] sm:$0xff] }
  0x8a   : > { %v508_v35 = vpop.permute.xlu0 %507 }
  0x8b   : > { %734 = vrot.lane.b32.xlu1 %v3308_v21, %s2872_s13  ;;  %740 = vrot.lane.b32.xlu0 %v656_v22, %s2872_s13  ;;  %604 = vst.msk [vmem:[#allocation3] sm:$0xff] %vm603_vm3, %v508_v35 }
  0x8e   : > { %v510_v44 = vpop.permute.xlu0 %509 }
  0x8f   : > { %738 = vrot.lane.b32.xlu1 %v655_v23, %s2872_s13  ;;  %744 = vrot.lane.b32.xlu0 %v658_v24, %s2872_s13  ;;  %605 = vst.msk [vmem:[#allocation3 + $0x8] sm:$0xff] %vm603_vm3, %v510_v44  ;;  %v666_v23 = vld [vmem:[#allocation2 + $0x16a] sm:$0xff] }
  0x93   : > { %742 = vrot.lane.b32.xlu1 %v657_v28, %s2872_s13  ;;  %748 = vrot.lane.b32.xlu0 %v660_v29, %s2872_s13  ;;  %v665_v28 = vld [vmem:[#allocation2 + $0x15a] sm:$0xff] }
  0x97   : > { %746 = vrot.lane.b32.xlu1 %v659_v33, %s2872_s13  ;;  %752 = vrot.lane.b32.xlu0 %v662_v34, %s2872_s13  ;;  %v667_v34 = vld [vmem:[#allocation2 + $0x172] sm:$0xff] }
  0x9b   : > { %750 = vrot.lane.b32.xlu1 %v661_v36, %s2872_s13  ;;  %756 = vrot.lane.b32.xlu0 %v664_v37, %s2872_s13 }
  0x9d   : > { %v512_v22 = vpop.permute.xlu1 %511  ;;  %v516_v24 = vpop.permute.xlu0 %515 }
  0x9e   : > { %606 = vst.msk [vmem:[#allocation3 + $0x10] sm:$0xff] %vm603_vm3, %v512_v22  ;;  %608 = vst.msk [vmem:[#allocation3 + $0x20] sm:$0xff] %vm603_vm3, %v516_v24 }
  0x9f   : > { %754 = vrot.lane.b32.xlu1 %v663_v20, %s2872_s13  ;;  %760 = vrot.lane.b32.xlu0 %v666_v23, %s2872_s13 }
  0xa1   : > { %v514_v29 = vpop.permute.xlu1 %513  ;;  %v520_v33 = vpop.permute.xlu0 %519 }
  0xa2   : > { %607 = vst.msk [vmem:[#allocation3 + $0x18] sm:$0xff] %vm603_vm3, %v514_v29  ;;  %610 = vst.msk [vmem:[#allocation3 + $0x30] sm:$0xff] %vm603_vm3, %v520_v33 }
  0xa3   : > { %758 = vrot.lane.b32.xlu1 %v665_v28, %s2872_s13  ;;  %893 = vrot.lane.b32.xlu0 %v3123_v48, %s2873_s14 }
  0xa5   : > { %v518_v35 = vpop.permute.xlu1 %517  ;;  %v524_v36 = vpop.permute.xlu0 %523 }
  0xa6   : > { %609 = vst.msk [vmem:[#allocation3 + $0x28] sm:$0xff] %vm603_vm3, %v518_v35  ;;  %612 = vst.msk [vmem:[#allocation3 + $0x40] sm:$0xff] %vm603_vm3, %v524_v36 }
  0xa7   : > { %762 = vrot.lane.b32.xlu1 %v667_v34, %s2872_s13  ;;  %897 = vrot.lane.b32.xlu0 %v3129_v49, %s2873_s14  ;;  %s3840_s13 = scalar_lea.vmem %s4124_s4, %s2651_s8  ;;  %s2647_s8 = sshll.u32 %s2937_s23, 4 }
  0xa8   : > { %s4052_s26 = scalar_lea.hbm %s4126_s6, %s2647_s8 }
  0xa9   : > { %v522_v37 = vpop.permute.xlu1 %521  ;;  %v528_v44 = vpop.permute.xlu0 %527 }
  0xaa   : > { %611 = vst.msk [vmem:[#allocation3 + $0x38] sm:$0xff] %vm603_vm3, %v522_v37  ;;  %614 = vst.msk [vmem:[#allocation3 + $0x50] sm:$0xff] %vm603_vm3, %v528_v44  ;;  %v2771_v44 = vld [vmem:[%s4123_s3] sm:$0xff]  }
  0xab   : > { %895 = vrot.lane.b32.xlu1 %v3131_v50, %s2873_s14  ;;  %901 = vrot.lane.b32.xlu0 %v3137_v52, %s2873_s14 }
  0xac   : > { %2672 = vmatprep.subr.bf16.mxu0 %v2771_v44  ;;  %2710 = vmatprep.subr.bf16.mxu1 %v2771_v44 }
  0xad   : > { %v526_v48 = vpop.permute.xlu1 %525  ;;  %v532_v20 = vpop.permute.xlu0 %531  ;;  %2673 = vmatpush3.bf16.msra.mxu0 %v2771_v44  ;;  %2713 = vmatpush3.bf16.msra.mxu1 %v2771_v44 }
  0xae   : > { %613 = vst.msk [vmem:[#allocation3 + $0x48] sm:$0xff] %vm603_vm3, %v526_v48  ;;  %616 = vst.msk [vmem:[#allocation3 + $0x60] sm:$0xff] %vm603_vm3, %v532_v20 }
  0xaf   : > { %899 = vrot.lane.b32.xlu1 %v3143_v54, %s2873_s14  ;;  %905 = vrot.lane.b32.xlu0 %v3145_v55, %s2873_s14 }
  0xb1   : > { %v530_v22 = vpop.permute.xlu1 %529  ;;  %v536_v50 = vpop.permute.xlu0 %535 }
  0xb2   : > { %615 = vst.msk [vmem:[#allocation3 + $0x58] sm:$0xff] %vm603_vm3, %v530_v22  ;;  %618 = vst.msk [vmem:[#allocation3 + $0x70] sm:$0xff] %vm603_vm3, %v536_v50 }
  0xb3   : > { %903 = vrot.lane.b32.xlu1 %v3151_v57, %s2873_s14  ;;  %909 = vrot.lane.b32.xlu0 %v3153_v58, %s2873_s14 }
  0xb5   : > { %v534_v23 = vpop.permute.xlu1 %533  ;;  %v540_v24 = vpop.permute.xlu0 %539 }
  0xb6   : > { %617 = vst.msk [vmem:[#allocation3 + $0x68] sm:$0xff] %vm603_vm3, %v534_v23  ;;  %620 = vst.msk [vmem:[#allocation3 + $0x80] sm:$0xff] %vm603_vm3, %v540_v24 }
  0xb7   : > { %907 = vrot.lane.b32.xlu1 %v3155_v59, %s2873_s14  ;;  %1088 = vrot.lane.b32.xlu0 %v3066_v27, %s2874_s15 }
  0xb9   : > { %v538_v28 = vpop.permute.xlu1 %537  ;;  %v544_v29 = vpop.permute.xlu0 %543 }
  0xba   : > { %619 = vst.msk [vmem:[#allocation3 + $0x78] sm:$0xff] %vm603_vm3, %v538_v28  ;;  %622 = vst.msk [vmem:[#allocation3 + $0x90] sm:$0xff] %vm603_vm3, %v544_v29 }
  0xbb   : > { %1086 = vrot.lane.b32.xlu1 %v3057_v25, %s2874_s15  ;;  %1092 = vrot.lane.b32.xlu0 %v3078_v31, %s2874_s15 }
  0xbd   : > { %v542_v33 = vpop.permute.xlu1 %541  ;;  %v548_v34 = vpop.permute.xlu0 %547 }
  0xbe   : > { %621 = vst.msk [vmem:[#allocation3 + $0x88] sm:$0xff] %vm603_vm3, %v542_v33  ;;  %624 = vst.msk [vmem:[#allocation3 + $0xa0] sm:$0xff] %vm603_vm3, %v548_v34 }
  0xbf   : > { %1090 = vrot.lane.b32.xlu1 %v3059_v26, %s2874_s15  ;;  %1281 = vrot.lane.b32.xlu0 %v3254_v47, %s2875_s16 }
  0xc1   : > { %v546_v27 = vpop.permute.xlu1 %545  ;;  %v552_v25 = vpop.permute.xlu0 %551 }
  0xc2   : > { %623 = vst.msk [vmem:[#allocation3 + $0x98] sm:$0xff] %vm603_vm3, %v546_v27  ;;  %626 = vst.msk [vmem:[#allocation3 + $0xb0] sm:$0xff] %vm603_vm3, %v552_v25 }
  0xc3   : > { %1279 = vrot.lane.b32.xlu1 %v3246_v39, %s2875_s16  ;;  %1285 = vrot.lane.b32.xlu0 %v3262_v53, %s2875_s16 }
  0xc5   : > { %v550_v35 = vpop.permute.xlu1 %549  ;;  %v556_v36 = vpop.permute.xlu0 %555 }
  0xc6   : > { %625 = vst.msk [vmem:[#allocation3 + $0xa8] sm:$0xff] %vm603_vm3, %v550_v35  ;;  %628 = vst.msk [vmem:[#allocation3 + $0xc0] sm:$0xff] %vm603_vm3, %v556_v36 }
  0xc7   : > { %1283 = vrot.lane.b32.xlu1 %v3251_v45, %s2875_s16  ;;  %1475 = vrot.lane.b32.xlu0 %v3143_v54, %s2876_s17 }
  0xc9   : > { %v554_v47 = vpop.permute.xlu1 %553  ;;  %v560_v39 = vpop.permute.xlu0 %559 }
  0xca   : > { %627 = vst.msk [vmem:[#allocation3 + $0xb8] sm:$0xff] %vm603_vm3, %v554_v47  ;;  %630 = vst.msk [vmem:[#allocation3 + $0xd0] sm:$0xff] %vm603_vm3, %v560_v39 }
  0xcb   : > { %1473 = vrot.lane.b32.xlu1 %v3129_v49, %s2876_s17  ;;  %1479 = vrot.lane.b32.xlu0 %v3151_v57, %s2876_s17  ;;  %v2772_v57 = vld [vmem:[%s4123_s3 + $0x8] sm:$0xff]  }
  0xcc   : > { %2674 = vmatprep.subr.bf16.mxu0 %v2772_v57  ;;  %2711 = vmatprep.subr.bf16.mxu1 %v2772_v57 }
  0xcd   : > { %v558_v37 = vpop.permute.xlu1 %557  ;;  %v564_v54 = vpop.permute.xlu0 %563  ;;  %2675 = vmatpush3.bf16.msra.mxu0 %v2772_v57  ;;  %2714 = vmatpush3.bf16.msra.mxu1 %v2772_v57 }
  0xce   : > { %629 = vst.msk [vmem:[#allocation3 + $0xc8] sm:$0xff] %vm603_vm3, %v558_v37  ;;  %632 = vst.msk [vmem:[#allocation3 + $0xe0] sm:$0xff] %vm603_vm3, %v564_v54 }
  0xcf   : > { %1477 = vrot.lane.b32.xlu1 %v3137_v52, %s2876_s17  ;;  %1668 = vrot.lane.b32.xlu0 %v3078_v31, %s2877_s20  ;;  %v2773_v31 = vld [vmem:[%s4123_s3 + $0x10] ss:$0 sps:$4 sm:$0x33]  }
  0xd0   : > { %2716 = vmatprep.subr.msk.bf16.mxu0 %vm2105_vm5, %v2773_v31  ;;  %v2107_v20 = vsel %vm2105_vm5, %v2773_v31, 0  ;;  %2717 = vmatprep.subr.msk.bf16.mxu1 %vm2105_vm5, %v2773_v31  ;;  %v1611_v31 = vld [vmem:[#allocation2 + $0x99] sm:$0xff] }
  0xd1   : > { %v562_v49 = vpop.permute.xlu1 %561  ;;  %v568_v52 = vpop.permute.xlu0 %567  ;;  %2677 = vmatpush3.bf16.msra.mxu0 %v2107_v20  ;;  %2715 = vmatpush3.bf16.msra.mxu1 %v2107_v20  ;;  %v1613_v20 = vld [vmem:[#allocation2 + $0xb1] sm:$0xff] }
  0xd2   : > { %631 = vst.msk [vmem:[#allocation3 + $0xd8] sm:$0xff] %vm603_vm3, %v562_v49  ;;  %634 = vst.msk [vmem:[#allocation3 + $0xf0] sm:$0xff] %vm603_vm3, %v568_v52  ;;  %v1612_v52 = vld [vmem:[#allocation2 + $0xa9] sm:$0xff] }
  0xd3   : > { %1666 = vrot.lane.b32.xlu1 %v3059_v26, %s2877_s20  ;;  %1672 = vrot.lane.b32.xlu0 %v3094_v38, %s2877_s20 }
  0xd5   : > { %v566_v48 = vpop.permute.xlu1 %565  ;;  %v701_v26 = vpop.permute.xlu0 %700 }
  0xd6   : > { %633 = vst.msk [vmem:[#allocation3 + $0xe8] sm:$0xff] %vm603_vm3, %v566_v48 }
  0xd7   : > { %1670 = vrot.lane.b32.xlu1 %v3074_v30, %s2877_s20  ;;  %797 = vst.msk [vmem:[#allocation3] sm:$0xff] %vm796_vm4, %v701_v26  ;;  %1861 = vrot.lane.b32.xlu0 %v3262_v53, %s2878_s10 }
  0xd9   : > { %v570_v22 = vpop.permute.xlu1 %569  ;;  %v705_v50 = vpop.permute.xlu0 %704 }
  0xda   : > { %635 = vst.msk [vmem:[#allocation3 + $0xf8] sm:$0xff] %vm603_vm3, %v570_v22 }
  0xdb   : > { %1859 = vrot.lane.b32.xlu1 %v3251_v45, %s2878_s10  ;;  %799 = vst.msk [vmem:[#allocation3 + $0x10] sm:$0xff] %vm796_vm4, %v705_v50  ;;  %1865 = vrot.lane.b32.xlu0 %v3270_v63, %s2878_s10 }
  0xdd   : > { %v703_v23 = vpop.permute.xlu1 %702  ;;  %v709_v53 = vpop.permute.xlu0 %708 }
  0xde   : > { %798 = vst.msk [vmem:[#allocation3 + $0x8] sm:$0xff] %vm796_vm4, %v703_v23  ;;  %801 = vst.msk [vmem:[#allocation3 + $0x20] sm:$0xff] %vm796_vm4, %v709_v53 }
  0xdf   : > { %1863 = vrot.lane.b32.xlu1 %v3258_v51, %s2878_s10  ;;  %1096 = vrot.lane.b32.xlu0 %v3094_v38, %s2874_s15 }
  0xe1   : > { %v707_v24 = vpop.permute.xlu1 %706  ;;  %v713_v45 = vpop.permute.xlu0 %712 }
  0xe2   : > { %800 = vst.msk [vmem:[#allocation3 + $0x18] sm:$0xff] %vm796_vm4, %v707_v24  ;;  %803 = vst.msk [vmem:[#allocation3 + $0x30] sm:$0xff] %vm796_vm4, %v713_v45 }
  0xe3   : > { %1094 = vrot.lane.b32.xlu1 %v3074_v30, %s2874_s15  ;;  %1100 = vrot.lane.b32.xlu0 %v3106_v41, %s2874_s15 }
  0xe5   : > { %v711_v28 = vpop.permute.xlu1 %710  ;;  %v717_v29 = vpop.permute.xlu0 %716 }
  0xe6   : > { %802 = vst.msk [vmem:[#allocation3 + $0x28] sm:$0xff] %vm796_vm4, %v711_v28  ;;  %805 = vst.msk [vmem:[#allocation3 + $0x40] sm:$0xff] %vm796_vm4, %v717_v29  ;;  %v1036_v28 = vld [vmem:[#allocation2 + $0xc1] sm:$0xff] }
  0xe7   : > { %1098 = vrot.lane.b32.xlu1 %v3082_v32, %s2874_s15  ;;  %1289 = vrot.lane.b32.xlu0 %v3270_v63, %s2875_s16 }
  0xe9   : > { %v715_v38 = vpop.permute.xlu1 %714  ;;  %v721_v30 = vpop.permute.xlu0 %720 }
  0xea   : > { %804 = vst.msk [vmem:[#allocation3 + $0x38] sm:$0xff] %vm796_vm4, %v715_v38  ;;  %807 = vst.msk [vmem:[#allocation3 + $0x50] sm:$0xff] %vm796_vm4, %v721_v30  ;;  %v1037_v30 = vld [vmem:[#allocation2 + $0xc9] sm:$0xff] }
  0xeb   : > { %1287 = vrot.lane.b32.xlu1 %v3258_v51, %s2875_s16  ;;  %1293 = vrot.lane.b32.xlu0 %v3278_v12, %s2875_s16 }
  0xed   : > { %v719_v33 = vpop.permute.xlu1 %718  ;;  %v725_v34 = vpop.permute.xlu0 %724 }
  0xee   : > { %806 = vst.msk [vmem:[#allocation3 + $0x48] sm:$0xff] %vm796_vm4, %v719_v33  ;;  %809 = vst.msk [vmem:[#allocation3 + $0x60] sm:$0xff] %vm796_vm4, %v725_v34 }
  0xef   : > { %1291 = vrot.lane.b32.xlu1 %v3266_v56, %s2875_s16  ;;  %1483 = vrot.lane.b32.xlu0 %v3155_v59, %s2876_s17 }
  0xf1   : > { %v723_v63 = vpop.permute.xlu1 %722  ;;  %v729_v51 = vpop.permute.xlu0 %728 }
  0xf2   : > { %808 = vst.msk [vmem:[#allocation3 + $0x58] sm:$0xff] %vm796_vm4, %v723_v63  ;;  %811 = vst.msk [vmem:[#allocation3 + $0x70] sm:$0xff] %vm796_vm4, %v729_v51 }
  0xf3   : > { %1481 = vrot.lane.b32.xlu1 %v3145_v55, %s2876_s17  ;;  %1487 = vrot.lane.b32.xlu0 %v3166_v61, %s2876_s17 }
  0xf5   : > { %v727_v27 = vpop.permute.xlu1 %726  ;;  %v733_v25 = vpop.permute.xlu0 %732 }
  0xf6   : > { %810 = vst.msk [vmem:[#allocation3 + $0x68] sm:$0xff] %vm796_vm4, %v727_v27  ;;  %813 = vst.msk [vmem:[#allocation3 + $0x80] sm:$0xff] %vm796_vm4, %v733_v25 }
  0xf7   : > { %1485 = vrot.lane.b32.xlu1 %v3153_v58, %s2876_s17  ;;  %1676 = vrot.lane.b32.xlu0 %v3106_v41, %s2877_s20 }
  0xf9   : > { %v731_v59 = vpop.permute.xlu1 %730  ;;  %v737_v55 = vpop.permute.xlu0 %736 }
  0xfa   : > { %812 = vst.msk [vmem:[#allocation3 + $0x78] sm:$0xff] %vm796_vm4, %v731_v59  ;;  %815 = vst.msk [vmem:[#allocation3 + $0x90] sm:$0xff] %vm796_vm4, %v737_v55  ;;  %v1616_v55 = vld [vmem:[#allocation2 + $0xd9] sm:$0xff] }
  0xfb   : > { %1674 = vrot.lane.b32.xlu1 %v3082_v32, %s2877_s20  ;;  %1680 = vrot.lane.b32.xlu0 %v3114_v43, %s2877_s20 }
  0xfd   : > { %v735_v35 = vpop.permute.xlu1 %734  ;;  %v741_v58 = vpop.permute.xlu0 %740 }
  0xfe   : > { %814 = vst.msk [vmem:[#allocation3 + $0x88] sm:$0xff] %vm796_vm4, %v735_v35  ;;  %817 = vst.msk [vmem:[#allocation3 + $0xa0] sm:$0xff] %vm796_vm4, %v741_v58 }
  0xff   : > { %1678 = vrot.lane.b32.xlu1 %v3102_v40, %s2877_s20  ;;  %1869 = vrot.lane.b32.xlu0 %v3278_v12, %s2878_s10 }
 0x101   : > { %v739_v41 = vpop.permute.xlu1 %738  ;;  %v745_v32 = vpop.permute.xlu0 %744 }
 0x102   : > { %816 = vst.msk [vmem:[#allocation3 + $0x98] sm:$0xff] %vm796_vm4, %v739_v41  ;;  %819 = vst.msk [vmem:[#allocation3 + $0xb0] sm:$0xff] %vm796_vm4, %v745_v32 }
 0x103   : > { %1867 = vrot.lane.b32.xlu1 %v3266_v56, %s2878_s10  ;;  %1873 = vrot.lane.b32.xlu0 %v3286_v15, %s2878_s10 }
 0x105   : > { %v743_v36 = vpop.permute.xlu1 %742  ;;  %v749_v47 = vpop.permute.xlu0 %748 }
 0x106   : > { %818 = vst.msk [vmem:[#allocation3 + $0xa8] sm:$0xff] %vm796_vm4, %v743_v36  ;;  %821 = vst.msk [vmem:[#allocation3 + $0xc0] sm:$0xff] %vm796_vm4, %v749_v47  ;;  %v1807_v36 = vld [vmem:[#allocation2 + $0xc2] sm:$0xff] }
 0x107   : > { %1871 = vrot.lane.b32.xlu1 %v3274_v11, %s2878_s10  ;;  %913 = vrot.lane.b32.xlu0 %v3164_v60, %s2873_s14 }
 0x109   : > { %v747_v12 = vpop.permute.xlu1 %746  ;;  %v753_v56 = vpop.permute.xlu0 %752 }
 0x10a   : > { %820 = vst.msk [vmem:[#allocation3 + $0xb8] sm:$0xff] %vm796_vm4, %v747_v12  ;;  %823 = vst.msk [vmem:[#allocation3 + $0xd0] sm:$0xff] %vm796_vm4, %v753_v56  ;;  %v1617_v12 = vld [vmem:[#allocation2 + $0xe1] sm:$0xff] }
 0x10b   : > { %911 = vrot.lane.b32.xlu1 %v3166_v61, %s2873_s14  ;;  %1102 = vrot.lane.b32.xlu0 %v3102_v40, %s2874_s15 }
 0x10d   : > { %v751_v39 = vpop.permute.xlu1 %750  ;;  %v757_v37 = vpop.permute.xlu0 %756 }
 0x10e   : > { %822 = vst.msk [vmem:[#allocation3 + $0xc8] sm:$0xff] %vm796_vm4, %v751_v39  ;;  %825 = vst.msk [vmem:[#allocation3 + $0xe0] sm:$0xff] %vm796_vm4, %v757_v37  ;;  %v1809_v39 = vld [vmem:[#allocation2 + $0xda] sm:$0xff] }
 0x10f   : > { %915 = vrot.lane.b32.xlu1 %v3176_v0, %s2873_s14  ;;  %1106 = vrot.lane.b32.xlu0 %v3110_v42, %s2874_s15 }
 0x111   : > { %v755_v44 = vpop.permute.xlu1 %754  ;;  %v761_v61 = vpop.permute.xlu0 %760 }
 0x112   : > { %824 = vst.msk [vmem:[#allocation3 + $0xd8] sm:$0xff] %vm796_vm4, %v755_v44  ;;  %827 = vst.msk [vmem:[#allocation3 + $0xf0] sm:$0xff] %vm796_vm4, %v761_v61  ;;  %v1808_v44 = vld [vmem:[#allocation2 + $0xca] sm:$0xff] }
 0x113   : > { %1104 = vrot.lane.b32.xlu1 %v3114_v43, %s2874_s15  ;;  %1295 = vrot.lane.b32.xlu0 %v3274_v11, %s2875_s16 }
 0x115   : > { %v759_v40 = vpop.permute.xlu1 %758  ;;  %v894_v54 = vpop.permute.xlu0 %893 }
 0x116   : > { %826 = vst.msk [vmem:[#allocation3 + $0xe8] sm:$0xff] %vm796_vm4, %v759_v40 }
 0x117   : > { %1108 = vrot.lane.b32.xlu1 %v3120_v46, %s2874_s15  ;;  %990 = vst.msk [vmem:[#allocation3] sm:$0xff] %vm989_vm6, %v894_v54  ;;  %1299 = vrot.lane.b32.xlu0 %v3282_v13, %s2875_s16  ;;  %v1810_v54 = vld [vmem:[#allocation2 + $0xe2] sm:$0xff] }
 0x119   : > { %v763_v42 = vpop.permute.xlu1 %762  ;;  %v898_v43 = vpop.permute.xlu0 %897 }
 0x11a   : > { %828 = vst.msk [vmem:[#allocation3 + $0xf8] sm:$0xff] %vm796_vm4, %v763_v42 }
 0x11b   : > { %1297 = vrot.lane.b32.xlu1 %v3286_v15, %s2875_s16  ;;  %992 = vst.msk [vmem:[#allocation3 + $0x10] sm:$0xff] %vm989_vm6, %v898_v43  ;;  %1489 = vrot.lane.b32.xlu0 %v3164_v60, %s2876_s17  ;;  %v1610_v15 = vld [vmem:[#allocation2 + $0x91] sm:$0xff] }
 0x11d   : > { %v896_v11 = vpop.permute.xlu1 %895  ;;  %v902_v46 = vpop.permute.xlu0 %901 }
 0x11e   : > { %991 = vst.msk [vmem:[#allocation3 + $0x8] sm:$0xff] %vm989_vm6, %v896_v11  ;;  %994 = vst.msk [vmem:[#allocation3 + $0x20] sm:$0xff] %vm989_vm6, %v902_v46 }
 0x11f   : > { %1301 = vrot.lane.b32.xlu1 %v3294_v17, %s2875_s16  ;;  %1493 = vrot.lane.b32.xlu0 %v3168_v62, %s2876_s17 }
 0x121   : > { %v900_v49 = vpop.permute.xlu1 %899  ;;  %v906_v57 = vpop.permute.xlu0 %905 }
 0x122   : > { %993 = vst.msk [vmem:[#allocation3 + $0x18] sm:$0xff] %vm989_vm6, %v900_v49  ;;  %996 = vst.msk [vmem:[#allocation3 + $0x30] sm:$0xff] %vm989_vm6, %v906_v57  ;;  %v1040_v49 = vld [vmem:[#allocation2 + $0xf1] sm:$0xff] }
 0x123   : > { %1491 = vrot.lane.b32.xlu1 %v3176_v0, %s2876_s17  ;;  %1682 = vrot.lane.b32.xlu0 %v1610_v15, %s2877_s20 }
 0x125   : > { %v904_v60 = vpop.permute.xlu1 %903  ;;  %v910_v48 = vpop.permute.xlu0 %909 }
 0x126   : > { %995 = vst.msk [vmem:[#allocation3 + $0x28] sm:$0xff] %vm989_vm6, %v904_v60  ;;  %998 = vst.msk [vmem:[#allocation3 + $0x40] sm:$0xff] %vm989_vm6, %v910_v48  ;;  %v1041_v60 = vld [vmem:[#allocation2 + $0xf9] sm:$0xff] }
 0x127   : > { %1495 = vrot.lane.b32.xlu1 %v3180_v2, %s2876_s17  ;;  %1686 = vrot.lane.b32.xlu0 %v1612_v52, %s2877_s20  ;;  %v1233_v48 = vld [vmem:[#allocation2 + $0xf2] sm:$0xff] }
 0x129   : > { %v908_v26 = vpop.permute.xlu1 %907  ;;  %v1089_v0 = vpop.permute.xlu0 %1088 }
 0x12a   : > { %997 = vst.msk [vmem:[#allocation3 + $0x38] sm:$0xff] %vm989_vm6, %v908_v26 }
 0x12b   : > { %1684 = vrot.lane.b32.xlu1 %v1611_v31, %s2877_s20  ;;  %1184 = vst.msk [vmem:[#allocation3 + $0x8] sm:$0xff] %vm1182_vm7, %v1089_v0  ;;  %1875 = vrot.lane.b32.xlu0 %v3282_v13, %s2878_s10  ;;  %v302_v31 = vld [vmem:[%s3012_s11 + $0xf0] sm:$0xff]  ;;  %v303_v0 = vld [vmem:[%s3012_s11 + $0xf8] sm:$0xff] }
 0x12c   : > { %377 = vst.msk [vmem:[#allocation2 + $0x181] sm:$0xff] %vm304_vm0, %v302_v31  ;;  %378 = vst.msk [vmem:[#allocation2 + $0x189] sm:$0xff] %vm304_vm0, %v303_v0 }
 0x12d   : > { %v1087_v22 = vpop.permute.xlu1 %1086  ;;  %v1093_v50 = vpop.permute.xlu0 %1092 }
 0x12e   : > { %1183 = vst.msk [vmem:[#allocation3] sm:$0xff] %vm1182_vm7, %v1087_v22  ;;  %1186 = vst.msk [vmem:[#allocation3 + $0x18] sm:$0xff] %vm1182_vm7, %v1093_v50 }
 0x12f   : > { %1688 = vrot.lane.b32.xlu1 %v1613_v20, %s2877_s20  ;;  %1879 = vrot.lane.b32.xlu0 %v3290_v16, %s2878_s10 }
 0x131   : > { %v1091_v23 = vpop.permute.xlu1 %1090  ;;  %v1282_v53 = vpop.permute.xlu0 %1281 }
 0x132   : > { %1185 = vst.msk [vmem:[#allocation3 + $0x10] sm:$0xff] %vm1182_vm7, %v1091_v23  ;;  %v1234_v23 = vld [vmem:[#allocation2 + $0xfa] sm:$0xff] }
 0x133   : > { %1877 = vrot.lane.b32.xlu1 %v3294_v17, %s2878_s10  ;;  %1377 = vst.msk [vmem:[#allocation3 + $0x8] sm:$0xff] %vm1375_vm8, %v1282_v53  ;;  %917 = vrot.lane.b32.xlu0 %v3168_v62, %s2873_s14 }
 0x135   : > { %v1280_v13 = vpop.permute.xlu1 %1279  ;;  %v1286_v24 = vpop.permute.xlu0 %1285 }
 0x136   : > { %1376 = vst.msk [vmem:[#allocation3] sm:$0xff] %vm1375_vm8, %v1280_v13  ;;  %1379 = vst.msk [vmem:[#allocation3 + $0x18] sm:$0xff] %vm1375_vm8, %v1286_v24 }
 0x137   : > { %1881 = vrot.lane.b32.xlu1 %v3302_v19, %s2878_s10  ;;  %921 = vrot.lane.b32.xlu0 %v3178_v1, %s2873_s14 }
 0x139   : > { %v1284_v45 = vpop.permute.xlu1 %1283  ;;  %v1476_v17 = vpop.permute.xlu0 %1475 }
 0x13a   : > { %1378 = vst.msk [vmem:[#allocation3 + $0x10] sm:$0xff] %vm1375_vm8, %v1284_v45 }
 0x13b   : > { %919 = vrot.lane.b32.xlu1 %v3180_v2, %s2873_s14  ;;  %1571 = vst.msk [vmem:[#allocation3 + $0x8] sm:$0xff] %vm1569_vm9, %v1476_v17  ;;  %1110 = vrot.lane.b32.xlu0 %v1612_v52, %s2874_s15 }
 0x13d   : > { %v1474_v62 = vpop.permute.xlu1 %1473  ;;  %v1480_v29 = vpop.permute.xlu0 %1479 }
 0x13e   : > { %1570 = vst.msk [vmem:[#allocation3] sm:$0xff] %vm1569_vm9, %v1474_v62  ;;  %1573 = vst.msk [vmem:[#allocation3 + $0x18] sm:$0xff] %vm1569_vm9, %v1480_v29 }
 0x13f   : > { %923 = vrot.lane.b32.xlu1 %v3191_v4, %s2873_s14  ;;  %1114 = vrot.lane.b32.xlu0 %v1036_v28, %s2874_s15 }
 0x141   : > { %v1478_v38 = vpop.permute.xlu1 %1477  ;;  %v1669_v2 = vpop.permute.xlu0 %1668 }
 0x142   : > { %1572 = vst.msk [vmem:[#allocation3 + $0x10] sm:$0xff] %vm1569_vm9, %v1478_v38 }
 0x143   : > { %1112 = vrot.lane.b32.xlu1 %v1613_v20, %s2874_s15  ;;  %1764 = vst.msk [vmem:[#allocation3 + $0x8] sm:$0xff] %vm1762_vm10, %v1669_v2  ;;  %1303 = vrot.lane.b32.xlu0 %v3290_v16, %s2875_s16  ;;  %v1620_v2 = vld [vmem:[#allocation2 + $0x109] sm:$0xff] }
 0x145   : > { %v1667_v33 = vpop.permute.xlu1 %1666  ;;  %v1673_v34 = vpop.permute.xlu0 %1672 }
 0x146   : > { %1763 = vst.msk [vmem:[#allocation3] sm:$0xff] %vm1762_vm10, %v1667_v33  ;;  %1766 = vst.msk [vmem:[#allocation3 + $0x18] sm:$0xff] %vm1762_vm10, %v1673_v34  ;;  %v1621_v34 = vld [vmem:[#allocation2 + $0x111] sm:$0xff] }
 0x147   : > { %1116 = vrot.lane.b32.xlu1 %v1037_v30, %s2874_s15  ;;  %1307 = vrot.lane.b32.xlu0 %v3298_v18, %s2875_s16 }
 0x149   : > { %v1671_v63 = vpop.permute.xlu1 %1670  ;;  %v1862_v51 = vpop.permute.xlu0 %1861 }
 0x14a   : > { %1765 = vst.msk [vmem:[#allocation3 + $0x10] sm:$0xff] %vm1762_vm10, %v1671_v63 }
 0x14b   : > { %1305 = vrot.lane.b32.xlu1 %v3302_v19, %s2875_s16  ;;  %1957 = vst.msk [vmem:[#allocation3 + $0x8] sm:$0xff] %vm1955_vm11, %v1862_v51  ;;  %1497 = vrot.lane.b32.xlu0 %v3178_v1, %s2876_s17  ;;  %v1813_v51 = vld [vmem:[#allocation2 + $0x10a] sm:$0xff] }
 0x14d   : > { %v1860_v16 = vpop.permute.xlu1 %1859  ;;  %v1866_v27 = vpop.permute.xlu0 %1865 }
 0x14e   : > { %1956 = vst.msk [vmem:[#allocation3] sm:$0xff] %vm1955_vm11, %v1860_v16  ;;  %1959 = vst.msk [vmem:[#allocation3 + $0x18] sm:$0xff] %vm1955_vm11, %v1866_v27 }
 0x14f   : > { %1309 = vrot.lane.b32.xlu1 %v3308_v21, %s2875_s16  ;;  %1501 = vrot.lane.b32.xlu0 %v3189_v3, %s2876_s17 }
 0x151   : > { %v1864_v18 = vpop.permute.xlu1 %1863  ;;  %v1097_v19 = vpop.permute.xlu0 %1096 }
 0x152   : > { %1958 = vst.msk [vmem:[#allocation3 + $0x10] sm:$0xff] %vm1955_vm11, %v1864_v18  ;;  %v1989_v25 = vld [vmem:[#allocation3 + $0x8] sm:$0xff] }
 0x153   : > { %1499 = vrot.lane.b32.xlu1 %v3191_v4, %s2876_s17  ;;  %1188 = vst.msk [vmem:[#allocation3 + $0x28] sm:$0xff] %vm1182_vm7, %v1097_v19  ;;  %1690 = vrot.lane.b32.xlu0 %v1036_v28, %s2877_s20  ;;  %v1814_v19 = vld [vmem:[#allocation2 + $0x112] sm:$0xff] }
 0x155   : > { %v1095_v1 = vpop.permute.xlu1 %1094  ;;  %v1988_v59 = vld [vmem:[#allocation3] sm:$0xff]  ;;  %v1101_v35 = vpop.permute.xlu0 %1100  ;;  %v1991_v58 = vld [vmem:[#allocation3 + $0x18] sm:$0xff] }
 0x156   : > { %1187 = vst.msk [vmem:[#allocation3 + $0x20] sm:$0xff] %vm1182_vm7, %v1095_v1  ;;  %v2020_v21 = vpack.c.bf16 %v1989_v25, %v1988_v59  ;;  %1190 = vst.msk [vmem:[#allocation3 + $0x38] sm:$0xff] %vm1182_vm7, %v1101_v35 }
 0x157   : > { %1503 = vrot.lane.b32.xlu1 %v3201_v6, %s2876_s17  ;;  %1694 = vrot.lane.b32.xlu0 %v1616_v55, %s2877_s20 }
 0x158   : > { %2678 = vmatprep.mubr.msk.bf16.mxu0 %vm2056_vm12, %v2020_v21 }
 0x159   : > { %v1099_v4 = vpop.permute.xlu1 %1098  ;;  %v1990_v41 = vld [vmem:[#allocation3 + $0x10] sm:$0xff]  ;;  %v1290_v47 = vpop.permute.xlu0 %1289 }
 0x15a   : > { %1189 = vst.msk [vmem:[#allocation3 + $0x30] sm:$0xff] %vm1182_vm7, %v1099_v4  ;;  %v2021_v32 = vpack.c.bf16 %v1991_v58, %v1990_v41  ;;  %v1045_v58 = vld [vmem:[#allocation2 + $0x129] sm:$0xff] }
 0x15b   : > { %1692 = vrot.lane.b32.xlu1 %v1037_v30, %s2877_s20  ;;  %1381 = vst.msk [vmem:[#allocation3 + $0x28] sm:$0xff] %vm1375_vm8, %v1290_v47  ;;  %1883 = vrot.lane.b32.xlu0 %v1807_v36, %s2878_s10  ;;  %v1429_v36 = vld [vmem:[#allocation2 + $0x120] sm:$0xff] }
 0x15c   : > { %2679 = vmatmul.mubr.msk.bf16.vlgmr.msra.gmra.mrb[0].mxu0 %vm2056_vm12, %v2021_v32 }
 0x15d   : > { %v1288_v56 = vpop.permute.xlu1 %1287  ;;  %v1294_v37 = vpop.permute.xlu0 %1293 }
 0x15e   : > { %1380 = vst.msk [vmem:[#allocation3 + $0x20] sm:$0xff] %vm1375_vm8, %v1288_v56  ;;  %1383 = vst.msk [vmem:[#allocation3 + $0x38] sm:$0xff] %vm1375_vm8, %v1294_v37  ;;  %v1238_v56 = vld [vmem:[#allocation2 + $0x12a] sm:$0xff] }
 0x15f   : > { %1696 = vrot.lane.b32.xlu1 %v1617_v12, %s2877_s20  ;;  %1887 = vrot.lane.b32.xlu0 %v1809_v39, %s2878_s10 }
 0x161   : > { %v1292_v61 = vpop.permute.xlu1 %1291  ;;  %v1484_v40 = vpop.permute.xlu0 %1483 }
 0x162   : > { %1382 = vst.msk [vmem:[#allocation3 + $0x30] sm:$0xff] %vm1375_vm8, %v1292_v61  ;;  %v1431_v61 = vld [vmem:[#allocation2 + $0x138] sm:$0xff] }
 0x163   : > { %1885 = vrot.lane.b32.xlu1 %v1808_v44, %s2878_s10  ;;  %1575 = vst.msk [vmem:[#allocation3 + $0x28] sm:$0xff] %vm1569_vm9, %v1484_v40  ;;  %925 = vrot.lane.b32.xlu0 %v3189_v3, %s2873_s14 }
 0x165   : > { %v1482_v42 = vpop.permute.xlu1 %1481  ;;  %v1488_v43 = vpop.permute.xlu0 %1487 }
 0x166   : > { %1574 = vst.msk [vmem:[#allocation3 + $0x20] sm:$0xff] %vm1569_vm9, %v1482_v42  ;;  %1577 = vst.msk [vmem:[#allocation3 + $0x38] sm:$0xff] %vm1569_vm9, %v1488_v43  ;;  %v1430_v42 = vld [vmem:[#allocation2 + $0x128] sm:$0xff] }
 0x167   : > { %1889 = vrot.lane.b32.xlu1 %v1810_v54, %s2878_s10  ;;  %929 = vrot.lane.b32.xlu0 %v3193_v5, %s2873_s14 }
 0x169   : > { %v1486_v11 = vpop.permute.xlu1 %1485  ;;  %v1677_v46 = vpop.permute.xlu0 %1676 }
 0x16a   : > { %1576 = vst.msk [vmem:[#allocation3 + $0x30] sm:$0xff] %vm1569_vm9, %v1486_v11 }
 0x16b   : > { %927 = vrot.lane.b32.xlu1 %v3201_v6, %s2873_s14  ;;  %1768 = vst.msk [vmem:[#allocation3 + $0x28] sm:$0xff] %vm1762_vm10, %v1677_v46  ;;  %1118 = vrot.lane.b32.xlu0 %v1616_v55, %s2874_s15  ;;  %v1044_v55 = vld [vmem:[#allocation2 + $0x121] sm:$0xff] }
 0x16d   : > { %v1675_v3 = vpop.permute.xlu1 %1674  ;;  %v1681_v15 = vpop.permute.xlu0 %1680 }
 0x16e   : > { %1767 = vst.msk [vmem:[#allocation3 + $0x20] sm:$0xff] %vm1762_vm10, %v1675_v3  ;;  %1770 = vst.msk [vmem:[#allocation3 + $0x38] sm:$0xff] %vm1762_vm10, %v1681_v15 }
 0x16f   : > { %931 = vrot.lane.b32.xlu1 %v3205_v8, %s2873_s14  ;;  %1122 = vrot.lane.b32.xlu0 %v1040_v49, %s2874_s15 }
 0x171   : > { %v1679_v57 = vpop.permute.xlu1 %1678  ;;  %v1870_v6 = vpop.permute.xlu0 %1869 }
 0x172   : > { %1769 = vst.msk [vmem:[#allocation3 + $0x30] sm:$0xff] %vm1762_vm10, %v1679_v57  ;;  %v1624_v57 = vld [vmem:[#allocation2 + $0x139] sm:$0xff] }
 0x173   : > { %1120 = vrot.lane.b32.xlu1 %v1617_v12, %s2874_s15  ;;  %1961 = vst.msk [vmem:[#allocation3 + $0x28] sm:$0xff] %vm1955_vm11, %v1870_v6  ;;  %1311 = vrot.lane.b32.xlu0 %v1809_v39, %s2875_s16 }
 0x175   : > { %v1868_v52 = vpop.permute.xlu1 %1867  ;;  %v1874_v26 = vpop.permute.xlu0 %1873 }
 0x176   : > { %1960 = vst.msk [vmem:[#allocation3 + $0x20] sm:$0xff] %vm1955_vm11, %v1868_v52  ;;  %1963 = vst.msk [vmem:[#allocation3 + $0x38] sm:$0xff] %vm1955_vm11, %v1874_v26  ;;  %v1817_v26 = vld [vmem:[#allocation2 + $0x13a] sm:$0xff] }
 0x177   : > { %1124 = vrot.lane.b32.xlu1 %v1041_v60, %s2874_s15  ;;  %1315 = vrot.lane.b32.xlu0 %v1233_v48, %s2875_s16 }
 0x179   : > { %v1872_v20 = vpop.permute.xlu1 %1871  ;;  %v914_v50 = vpop.permute.xlu0 %913 }
 0x17a   : > { %1962 = vst.msk [vmem:[#allocation3 + $0x30] sm:$0xff] %vm1955_vm11, %v1872_v20  ;;  %v1993_v22 = vld [vmem:[#allocation3 + $0x28] sm:$0xff] }
 0x17b   : > { %1313 = vrot.lane.b32.xlu1 %v1810_v54, %s2875_s16  ;;  %1000 = vst.msk [vmem:[#allocation3 + $0x50] sm:$0xff] %vm989_vm6, %v914_v50  ;;  %1505 = vrot.lane.b32.xlu0 %v3193_v5, %s2876_s17  ;;  %v1818_v50 = vld [vmem:[#allocation2 + $0x142] sm:$0xff] }
 0x17d   : > { %v912_v53 = vpop.permute.xlu1 %911  ;;  %v1992_v13 = vld [vmem:[#allocation3 + $0x20] sm:$0xff]  ;;  %v1995_v45 = vld [vmem:[#allocation3 + $0x38] sm:$0xff]  ;;  %v1103_v17 = vpop.permute.xlu0 %1102 }
 0x17e   : > { %999 = vst.msk [vmem:[#allocation3 + $0x48] sm:$0xff] %vm989_vm6, %v912_v53  ;;  %v2022_v24 = vpack.c.bf16 %v1993_v22, %v1992_v13  ;;  %v855_v53 = vld [vmem:[#allocation2 + $0x150] sm:$0xff] }
 0x17f   : > { %1317 = vrot.lane.b32.xlu1 %v1234_v23, %s2875_s16  ;;  %1191 = vst.msk [vmem:[#allocation3 + $0x40] sm:$0xff] %vm1182_vm7, %v1103_v17  ;;  %1509 = vrot.lane.b32.xlu0 %v3203_v7, %s2876_s17  ;;  %v856_v17 = vld [vmem:[#allocation2 + $0x158] sm:$0xff] }
 0x180   : > { %2682 = vmatprep.mubr.msk.bf16.mxu0 %vm2056_vm12, %v2022_v24 }
 0x181   : > { %v916_v62 = vpop.permute.xlu1 %915  ;;  %v1994_v28 = vld [vmem:[#allocation3 + $0x30] sm:$0xff]  ;;  %v1107_v5 = vpop.permute.xlu0 %1106 }
 0x182   : > { %1001 = vst.msk [vmem:[#allocation3 + $0x58] sm:$0xff] %vm989_vm6, %v916_v62  ;;  %v2023_v29 = vpack.c.bf16 %v1995_v45, %v1994_v28  ;;  %v1048_v28 = vld [vmem:[#allocation2 + $0x151] sm:$0xff] }
 0x183   : > { %1507 = vrot.lane.b32.xlu1 %v3205_v8, %s2876_s17  ;;  %1193 = vst.msk [vmem:[#allocation3 + $0x50] sm:$0xff] %vm1182_vm7, %v1107_v5  ;;  %1698 = vrot.lane.b32.xlu0 %v1040_v49, %s2877_s20  ;;  %v1432_v49 = vld [vmem:[#allocation2 + $0x140] sm:$0xff] }
 0x184   : > { %2683 = vmatmul.mubr.msk.bf16.gmra.mrb[4].mxu0 %vm2056_vm12, %v2023_v29 }
 0x185   : > { %v1105_v38 = vpop.permute.xlu1 %1104  ;;  %v1296_v30 = vpop.permute.xlu0 %1295 }
 0x186   : > { %1192 = vst.msk [vmem:[#allocation3 + $0x48] sm:$0xff] %vm1182_vm7, %v1105_v38 }
 0x187   : > { %1511 = vrot.lane.b32.xlu1 %v3216_v10, %s2876_s17  ;;  %1384 = vst.msk [vmem:[#allocation3 + $0x40] sm:$0xff] %vm1375_vm8, %v1296_v30  ;;  %1702 = vrot.lane.b32.xlu0 %v1620_v2, %s2877_s20 }
 0x189   : > { %v1109_v33 = vpop.permute.xlu1 %1108  ;;  %v1300_v8 = vpop.permute.xlu0 %1299 }
 0x18a   : > { %1194 = vst.msk [vmem:[#allocation3 + $0x58] sm:$0xff] %vm1182_vm7, %v1109_v33  ;;  %v1241_v33 = vld [vmem:[#allocation2 + $0x152] sm:$0xff] }
 0x18b   : > { %1700 = vrot.lane.b32.xlu1 %v1041_v60, %s2877_s20  ;;  %1386 = vst.msk [vmem:[#allocation3 + $0x50] sm:$0xff] %vm1375_vm8, %v1300_v8  ;;  %1891 = vrot.lane.b32.xlu0 %v1233_v48, %s2878_s10  ;;  %v1625_v48 = vld [vmem:[#allocation2 + $0x141] sm:$0xff] }
 0x18d   : > { %v1298_v63 = vpop.permute.xlu1 %1297  ;;  %v1490_v16 = vpop.permute.xlu0 %1489 }
 0x18e   : > { %1385 = vst.msk [vmem:[#allocation3 + $0x48] sm:$0xff] %vm1375_vm8, %v1298_v63 }
 0x18f   : > { %1704 = vrot.lane.b32.xlu1 %v1621_v34, %s2877_s20  ;;  %1578 = vst.msk [vmem:[#allocation3 + $0x40] sm:$0xff] %vm1569_vm9, %v1490_v16  ;;  %1895 = vrot.lane.b32.xlu0 %v1813_v51, %s2878_s10  ;;  %v1242_v16 = vld [vmem:[#allocation2 + $0x15a] sm:$0xff] }
 0x191   : > { %v1302_v27 = vpop.permute.xlu1 %1301  ;;  %v1494_v18 = vpop.permute.xlu0 %1493 }
 0x192   : > { %1387 = vst.msk [vmem:[#allocation3 + $0x58] sm:$0xff] %vm1375_vm8, %v1302_v27 }
 0x193   : > { %1893 = vrot.lane.b32.xlu1 %v1234_v23, %s2878_s10  ;;  %1580 = vst.msk [vmem:[#allocation3 + $0x50] sm:$0xff] %vm1569_vm9, %v1494_v18  ;;  %933 = vrot.lane.b32.xlu0 %v3203_v7, %s2873_s14 }
 0x195   : > { %v1492_v25 = vpop.permute.xlu1 %1491  ;;  %v1683_v1 = vpop.permute.xlu0 %1682 }
 0x196   : > { %1579 = vst.msk [vmem:[#allocation3 + $0x48] sm:$0xff] %vm1569_vm9, %v1492_v25  ;;  %v1435_v25 = vld [vmem:[#allocation2 + $0x168] sm:$0xff] }
 0x197   : > { %1897 = vrot.lane.b32.xlu1 %v1814_v19, %s2878_s10  ;;  %1771 = vst.msk [vmem:[#allocation3 + $0x40] sm:$0xff] %vm1762_vm10, %v1683_v1  ;;  %937 = vrot.lane.b32.xlu0 %v3214_v9, %s2873_s14 }
 0x199   : > { %v1496_v59 = vpop.permute.xlu1 %1495  ;;  %v1687_v21 = vpop.permute.xlu0 %1686 }
 0x19a   : > { %1581 = vst.msk [vmem:[#allocation3 + $0x58] sm:$0xff] %vm1569_vm9, %v1496_v59 }
 0x19b   : > { %935 = vrot.lane.b32.xlu1 %v3216_v10, %s2873_s14  ;;  %1773 = vst.msk [vmem:[#allocation3 + $0x50] sm:$0xff] %vm1762_vm10, %v1687_v21  ;;  %1126 = vrot.lane.b32.xlu0 %v1620_v2, %s2874_s15  ;;  %v1049_v2 = vld [vmem:[#allocation2 + $0x159] sm:$0xff] }
 0x19d   : > { %v1685_v7 = vpop.permute.xlu1 %1684  ;;  %v1876_v35 = vpop.permute.xlu0 %1875 }
 0x19e   : > { %1772 = vst.msk [vmem:[#allocation3 + $0x48] sm:$0xff] %vm1762_vm10, %v1685_v7 }
 0x19f   : > { %939 = vrot.lane.b32.xlu1 %v3224_v14, %s2873_s14  ;;  %1964 = vst.msk [vmem:[#allocation3 + $0x40] sm:$0xff] %vm1955_vm11, %v1876_v35  ;;  %1130 = vrot.lane.b32.xlu0 %v1044_v55, %s2874_s15  ;;  %v1237_v14 = vld [vmem:[#allocation2 + $0x122] sm:$0xff] }
 0x1a1   : > { %v1689_v9 = vpop.permute.xlu1 %1688  ;;  %v1880_v10 = vpop.permute.xlu0 %1879 }
 0x1a2   : > { %1774 = vst.msk [vmem:[#allocation3 + $0x58] sm:$0xff] %vm1762_vm10, %v1689_v9  ;;  %v1436_v9 = vld [vmem:[#allocation2 + $0x170] sm:$0xff] }
 0x1a3   : > { %1128 = vrot.lane.b32.xlu1 %v1621_v34, %s2874_s15  ;;  %1966 = vst.msk [vmem:[#allocation3 + $0x50] sm:$0xff] %vm1955_vm11, %v1880_v10  ;;  %1319 = vrot.lane.b32.xlu0 %v1813_v51, %s2875_s16 }
 0x1a5   : > { %v1878_v4 = vpop.permute.xlu1 %1877  ;;  %v918_v41 = vpop.permute.xlu0 %917 }
 0x1a6   : > { %1965 = vst.msk [vmem:[#allocation3 + $0x48] sm:$0xff] %vm1955_vm11, %v1878_v4  ;;  %v1996_v47 = vld [vmem:[#allocation3 + $0x40] sm:$0xff] }
 0x1a7   : > { %1132 = vrot.lane.b32.xlu1 %v1045_v58, %s2874_s15  ;;  %1002 = vst.msk [vmem:[#allocation3 + $0x60] sm:$0xff] %vm989_vm6, %v918_v41  ;;  %1323 = vrot.lane.b32.xlu0 %v1237_v14, %s2875_s16 }
 0x1a9   : > { %v1882_v32 = vpop.permute.xlu1 %1881  ;;  %v922_v12 = vpop.permute.xlu0 %921 }
 0x1aa   : > { %1967 = vst.msk [vmem:[#allocation3 + $0x58] sm:$0xff] %vm1955_vm11, %v1882_v32  ;;  %v1998_v40 = vld [vmem:[#allocation3 + $0x50] sm:$0xff]  ;;  %v1629_v32 = vld [vmem:[#allocation2 + $0x171] sm:$0xff] }
 0x1ab   : > { %1321 = vrot.lane.b32.xlu1 %v1814_v19, %s2875_s16  ;;  %1004 = vst.msk [vmem:[#allocation3 + $0x70] sm:$0xff] %vm989_vm6, %v922_v12  ;;  %1513 = vrot.lane.b32.xlu0 %v1429_v36, %s2876_s17 }
 0x1ad   : > { %v920_v39 = vpop.permute.xlu1 %919  ;;  %v1997_v37 = vld [vmem:[#allocation3 + $0x48] sm:$0xff]  ;;  %v1111_v54 = vpop.permute.xlu0 %1110 }
 0x1ae   : > { %1003 = vst.msk [vmem:[#allocation3 + $0x68] sm:$0xff] %vm989_vm6, %v920_v39  ;;  %v2024_v44 = vpack.c.bf16 %v1997_v37, %v1996_v47  ;;  %v1821_v47 = vld [vmem:[#allocation2 + $0x16a] sm:$0xff]  ;;  %v1822_v37 = vld [vmem:[#allocation2 + $0x172] sm:$0xff] }
 0x1af   : > { %1325 = vrot.lane.b32.xlu1 %v1238_v56, %s2875_s16  ;;  %1195 = vst.msk [vmem:[#allocation3 + $0x60] sm:$0xff] %vm1182_vm7, %v1111_v54  ;;  %1517 = vrot.lane.b32.xlu0 %v1431_v61, %s2876_s17 }
 0x1b0   : > { %2686 = vmatprep.mubr.msk.bf16.mxu0 %vm2056_vm12, %v2024_v44 }
 0x1b1   : > { %v924_v43 = vpop.permute.xlu1 %923  ;;  %v1999_v11 = vld [vmem:[#allocation3 + $0x58] sm:$0xff]  ;;  %v1115_v3 = vpop.permute.xlu0 %1114 }
 0x1b2   : > { %1005 = vst.msk [vmem:[#allocation3 + $0x78] sm:$0xff] %vm989_vm6, %v924_v43  ;;  %v2025_v46 = vpack.c.bf16 %v1999_v11, %v1998_v40  ;;  %v860_v43 = vld [vmem:[#allocation2 + $0x188] sm:$0xff] }
 0x1b3   : > { %1515 = vrot.lane.b32.xlu1 %v1430_v42, %s2876_s17  ;;  %1197 = vst.msk [vmem:[#allocation3 + $0x70] sm:$0xff] %vm1182_vm7, %v1115_v3  ;;  %1706 = vrot.lane.b32.xlu0 %v1044_v55, %s2877_s20 }
 0x1b4   : > { %2687 = vmatmul.mubr.msk.bf16.gmra.mrb[8].mxu0 %vm2056_vm12, %v2025_v46  ;;  %v1052_v46 = vld [vmem:[#allocation2 + $0x181] sm:$0xff] }
 0x1b5   : > { %v1113_v15 = vpop.permute.xlu1 %1112  ;;  %v1304_v6 = vpop.permute.xlu0 %1303 }
 0x1b6   : > { %1196 = vst.msk [vmem:[#allocation3 + $0x68] sm:$0xff] %vm1182_vm7, %v1113_v15 }
 0x1b7   : > { %1519 = vrot.lane.b32.xlu1 %v1432_v49, %s2876_s17  ;;  %1388 = vst.msk [vmem:[#allocation3 + $0x60] sm:$0xff] %vm1375_vm8, %v1304_v6  ;;  %1710 = vrot.lane.b32.xlu0 %v1624_v57, %s2877_s20 }
 0x1b9   : > { %v1117_v60 = vpop.permute.xlu1 %1116  ;;  %v1308_v52 = vpop.permute.xlu0 %1307 }
 0x1ba   : > { %1198 = vst.msk [vmem:[#allocation3 + $0x78] sm:$0xff] %vm1182_vm7, %v1117_v60  ;;  %v1245_v60 = vld [vmem:[#allocation2 + $0x182] sm:$0xff] }
 0x1bb   : > { %1708 = vrot.lane.b32.xlu1 %v1045_v58, %s2877_s20  ;;  %1390 = vst.msk [vmem:[#allocation3 + $0x70] sm:$0xff] %vm1375_vm8, %v1308_v52  ;;  %1899 = vrot.lane.b32.xlu0 %v1237_v14, %s2878_s10  ;;  %v1628_v58 = vld [vmem:[#allocation2 + $0x169] sm:$0xff] }
 0x1bd   : > { %v1306_v31 = vpop.permute.xlu1 %1305  ;;  %v1498_v0 = vpop.permute.xlu0 %1497 }
 0x1be   : > { %1389 = vst.msk [vmem:[#allocation3 + $0x68] sm:$0xff] %vm1375_vm8, %v1306_v31 }
 0x1bf   : > { %1712 = vrot.lane.b32.xlu1 %v1625_v48, %s2877_s20  ;;  %1582 = vst.msk [vmem:[#allocation3 + $0x60] sm:$0xff] %vm1569_vm9, %v1498_v0  ;;  %1903 = vrot.lane.b32.xlu0 %v1817_v26, %s2878_s10  ;;  %v1246_v0 = vld [vmem:[#allocation2 + $0x18a] sm:$0xff] }
 0x1c1   : > { %v1310_v20 = vpop.permute.xlu1 %1309  ;;  %v1502_v22 = vpop.permute.xlu0 %1501 }
 0x1c2   : > { %1391 = vst.msk [vmem:[#allocation3 + $0x78] sm:$0xff] %vm1375_vm8, %v1310_v20 }
 0x1c3   : > { %1901 = vrot.lane.b32.xlu1 %v1238_v56, %s2878_s10  ;;  %1584 = vst.msk [vmem:[#allocation3 + $0x70] sm:$0xff] %vm1569_vm9, %v1502_v22  ;;  %941 = vrot.lane.b32.xlu0 %v1431_v61, %s2873_s14  ;;  %v859_v61 = vld [vmem:[#allocation2 + $0x180] sm:$0xff] }
 0x1c5   : > { %v1500_v23 = vpop.permute.xlu1 %1499  ;;  %v1691_v13 = vpop.permute.xlu0 %1690 }
 0x1c6   : > { %1583 = vst.msk [vmem:[#allocation3 + $0x68] sm:$0xff] %vm1569_vm9, %v1500_v23  ;;  %v1439_v23 = vld [vmem:[#allocation2 + $0x198] sm:$0xff] }
 0x1c7   : > { %1905 = vrot.lane.b32.xlu1 %v1818_v50, %s2878_s10  ;;  %1775 = vst.msk [vmem:[#allocation3 + $0x60] sm:$0xff] %vm1762_vm10, %v1691_v13  ;;  %945 = vrot.lane.b32.xlu0 %v855_v53, %s2873_s14 }
 0x1c9   : > { %v1504_v24 = vpop.permute.xlu1 %1503  ;;  %v1695_v45 = vpop.permute.xlu0 %1694 }
 0x1ca   : > { %1585 = vst.msk [vmem:[#allocation3 + $0x78] sm:$0xff] %vm1569_vm9, %v1504_v24 }
 0x1cb   : > { %943 = vrot.lane.b32.xlu1 %v1432_v49, %s2873_s14  ;;  %1777 = vst.msk [vmem:[#allocation3 + $0x70] sm:$0xff] %vm1762_vm10, %v1695_v45  ;;  %1134 = vrot.lane.b32.xlu0 %v1624_v57, %s2874_s15  ;;  %v1053_v57 = vld [vmem:[#allocation2 + $0x189] sm:$0xff] }
 0x1cd   : > { %v1693_v62 = vpop.permute.xlu1 %1692  ;;  %v1884_v29 = vpop.permute.xlu0 %1883 }
 0x1ce   : > { %1776 = vst.msk [vmem:[#allocation3 + $0x68] sm:$0xff] %vm1762_vm10, %v1693_v62 }
 0x1cf   : > { %947 = vrot.lane.b32.xlu1 %v856_v17, %s2873_s14  ;;  %1968 = vst.msk [vmem:[#allocation3 + $0x60] sm:$0xff] %vm1955_vm11, %v1884_v29  ;;  %1138 = vrot.lane.b32.xlu0 %v1048_v28, %s2874_s15 }
 0x1d1   : > { %v1697_v5 = vpop.permute.xlu1 %1696  ;;  %v1888_v38 = vpop.permute.xlu0 %1887 }
 0x1d2   : > { %1778 = vst.msk [vmem:[#allocation3 + $0x78] sm:$0xff] %vm1762_vm10, %v1697_v5  ;;  %v1632_v5 = vld [vmem:[#allocation2 + $0x199] sm:$0xff] }
 0x1d3   : > { %1136 = vrot.lane.b32.xlu1 %v1625_v48, %s2874_s15  ;;  %1970 = vst.msk [vmem:[#allocation3 + $0x70] sm:$0xff] %vm1955_vm11, %v1888_v38  ;;  %1327 = vrot.lane.b32.xlu0 %v1817_v26, %s2875_s16 }
 0x1d5   : > { %v1886_v30 = vpop.permute.xlu1 %1885  ;;  %v926_v8 = vpop.permute.xlu0 %925 }
 0x1d6   : > { %1969 = vst.msk [vmem:[#allocation3 + $0x68] sm:$0xff] %vm1955_vm11, %v1886_v30  ;;  %v2000_v63 = vld [vmem:[#allocation3 + $0x60] sm:$0xff] }
 0x1d7   : > { %1140 = vrot.lane.b32.xlu1 %v1049_v2, %s2874_s15  ;;  %1006 = vst.msk [vmem:[#allocation3 + $0x80] sm:$0xff] %vm989_vm6, %v926_v8  ;;  %1331 = vrot.lane.b32.xlu0 %v1241_v33, %s2875_s16 }
 0x1d9   : > { %v1890_v34 = vpop.permute.xlu1 %1889  ;;  %v930_v51 = vpop.permute.xlu0 %929 }
 0x1da   : > { %1971 = vst.msk [vmem:[#allocation3 + $0x78] sm:$0xff] %vm1955_vm11, %v1890_v34  ;;  %v2002_v1 = vld [vmem:[#allocation3 + $0x70] sm:$0xff] }
 0x1db   : > { %1329 = vrot.lane.b32.xlu1 %v1818_v50, %s2875_s16  ;;  %1008 = vst.msk [vmem:[#allocation3 + $0x90] sm:$0xff] %vm989_vm6, %v930_v51  ;;  %1521 = vrot.lane.b32.xlu0 %v855_v53, %s2876_s17  ;;  %v1825_v34 = vld [vmem:[#allocation2 + $0x19a] sm:$0xff] }
 0x1dd   : > { %v928_v27 = vpop.permute.xlu1 %927  ;;  %v2001_v18 = vld [vmem:[#allocation3 + $0x68] sm:$0xff]  ;;  %v1119_v59 = vpop.permute.xlu0 %1118 }
 0x1de   : > { %1007 = vst.msk [vmem:[#allocation3 + $0x88] sm:$0xff] %vm989_vm6, %v928_v27  ;;  %v2026_v19 = vpack.c.bf16 %v2001_v18, %v2000_v63  ;;  %v1826_v27 = vld [vmem:[#allocation2 + $0x1a2] sm:$0xff] }
 0x1df   : > { %1333 = vrot.lane.b32.xlu1 %v1242_v16, %s2875_s16  ;;  %1199 = vst.msk [vmem:[#allocation3 + $0x80] sm:$0xff] %vm1182_vm7, %v1119_v59  ;;  %1525 = vrot.lane.b32.xlu0 %v1435_v25, %s2876_s17 }
 0x1e0   : > { %2690 = vmatprep.mubr.msk.bf16.mxu0 %vm2056_vm12, %v2026_v19 }
 0x1e1   : > { %v932_v21 = vpop.permute.xlu1 %931  ;;  %v2003_v7 = vld [vmem:[#allocation3 + $0x78] sm:$0xff]  ;;  %v1123_v35 = vpop.permute.xlu0 %1122 }
 0x1e2   : > { %1009 = vst.msk [vmem:[#allocation3 + $0x98] sm:$0xff] %vm989_vm6, %v932_v21  ;;  %v2027_v55 = vpack.c.bf16 %v2003_v7, %v2002_v1 }
 0x1e3   : > { %1523 = vrot.lane.b32.xlu1 %v856_v17, %s2876_s17  ;;  %1201 = vst.msk [vmem:[#allocation3 + $0x90] sm:$0xff] %vm1182_vm7, %v1123_v35  ;;  %1714 = vrot.lane.b32.xlu0 %v1048_v28, %s2877_s20  ;;  %v1440_v28 = vld [vmem:[#allocation2 + $0x1a0] sm:$0xff] }
 0x1e4   : > { %2691 = vmatmul.mubr.msk.bf16.gmra.mrb[12].mxu0 %vm2056_vm12, %v2027_v55 }
 0x1e5   : > { %v1121_v10 = vpop.permute.xlu1 %1120  ;;  %v1312_v4 = vpop.permute.xlu0 %1311 }
 0x1e6   : > { %1200 = vst.msk [vmem:[#allocation3 + $0x88] sm:$0xff] %vm1182_vm7, %v1121_v10 }
 0x1e7   : > { %1527 = vrot.lane.b32.xlu1 %v1436_v9, %s2876_s17  ;;  %1392 = vst.msk [vmem:[#allocation3 + $0x80] sm:$0xff] %vm1375_vm8, %v1312_v4  ;;  %1718 = vrot.lane.b32.xlu0 %v1628_v58, %s2877_s20 }
 0x1e9   : > { %v1125_v14 = vpop.permute.xlu1 %1124  ;;  %v1316_v41 = vpop.permute.xlu0 %1315 }
 0x1ea   : > { %1202 = vst.msk [vmem:[#allocation3 + $0x98] sm:$0xff] %vm1182_vm7, %v1125_v14 }
 0x1eb   : > { %1716 = vrot.lane.b32.xlu1 %v1049_v2, %s2877_s20  ;;  %1394 = vst.msk [vmem:[#allocation3 + $0x90] sm:$0xff] %vm1375_vm8, %v1316_v41  ;;  %1907 = vrot.lane.b32.xlu0 %v1241_v33, %s2878_s10  ;;  %v1633_v33 = vld [vmem:[#allocation2 + $0x1a1] sm:$0xff] }
 0x1ed   : > { %v1314_v36 = vpop.permute.xlu1 %1313  ;;  %v1506_v12 = vpop.permute.xlu0 %1505 }
 0x1ee   : > { %1393 = vst.msk [vmem:[#allocation3 + $0x88] sm:$0xff] %vm1375_vm8, %v1314_v36 }
 0x1ef   : > { %1720 = vrot.lane.b32.xlu1 %v1629_v32, %s2877_s20  ;;  %1586 = vst.msk [vmem:[#allocation3 + $0x80] sm:$0xff] %vm1569_vm9, %v1506_v12  ;;  %1911 = vrot.lane.b32.xlu0 %v1821_v47, %s2878_s10 }
 0x1f1   : > { %v1318_v56 = vpop.permute.xlu1 %1317  ;;  %v1510_v39 = vpop.permute.xlu0 %1509 }
 0x1f2   : > { %1395 = vst.msk [vmem:[#allocation3 + $0x98] sm:$0xff] %vm1375_vm8, %v1318_v56 }
 0x1f3   : > { %1909 = vrot.lane.b32.xlu1 %v1242_v16, %s2878_s10  ;;  %1588 = vst.msk [vmem:[#allocation3 + $0x90] sm:$0xff] %vm1569_vm9, %v1510_v39  ;;  %949 = vrot.lane.b32.xlu0 %v1435_v25, %s2873_s14 }
 0x1f5   : > { %v1508_v44 = vpop.permute.xlu1 %1507  ;;  %v1699_v40 = vpop.permute.xlu0 %1698 }
 0x1f6   : > { %1587 = vst.msk [vmem:[#allocation3 + $0x88] sm:$0xff] %vm1569_vm9, %v1508_v44 }
 0x1f7   : > { %1913 = vrot.lane.b32.xlu1 %v1822_v37, %s2878_s10  ;;  %1779 = vst.msk [vmem:[#allocation3 + $0x80] sm:$0xff] %vm1762_vm10, %v1699_v40  ;;  %953 = vrot.lane.b32.xlu0 %v859_v61, %s2873_s14 }
 0x1f9   : > { %v1512_v54 = vpop.permute.xlu1 %1511  ;;  %v1703_v42 = vpop.permute.xlu0 %1702 }
 0x1fa   : > { %1589 = vst.msk [vmem:[#allocation3 + $0x98] sm:$0xff] %vm1569_vm9, %v1512_v54 }
 0x1fb   : > { %951 = vrot.lane.b32.xlu1 %v1436_v9, %s2873_s14  ;;  %1781 = vst.msk [vmem:[#allocation3 + $0x90] sm:$0xff] %vm1762_vm10, %v1703_v42  ;;  %1142 = vrot.lane.b32.xlu0 %v1628_v58, %s2874_s15 }
 0x1fd   : > { %v1701_v11 = vpop.permute.xlu1 %1700  ;;  %v1892_v3 = vpop.permute.xlu0 %1891 }
 0x1fe   : > { %1780 = vst.msk [vmem:[#allocation3 + $0x88] sm:$0xff] %vm1762_vm10, %v1701_v11 }
 0x1ff   : > { %955 = vrot.lane.b32.xlu1 %v860_v43, %s2873_s14  ;;  %1972 = vst.msk [vmem:[#allocation3 + $0x80] sm:$0xff] %vm1955_vm11, %v1892_v3  ;;  %1146 = vrot.lane.b32.xlu0 %v1052_v46, %s2874_s15  ;;  %s254_s14 = scalar_lea.vmem [#allocation4], %s4034_s7 }
 0x201   : > { %v1705_v49 = vpop.permute.xlu1 %1704  ;;  %v1896_v15 = vpop.permute.xlu0 %1895 }
 0x202   : > { %1782 = vst.msk [vmem:[#allocation3 + $0x98] sm:$0xff] %vm1762_vm10, %v1705_v49 }
 0x203   : > { %1144 = vrot.lane.b32.xlu1 %v1629_v32, %s2874_s15  ;;  %1974 = vst.msk [vmem:[#allocation3 + $0x90] sm:$0xff] %vm1955_vm11, %v1896_v15  ;;  %1335 = vrot.lane.b32.xlu0 %v1821_v47, %s2875_s16 }
 0x205   : > { %v1894_v6 = vpop.permute.xlu1 %1893  ;;  %v934_v52 = vpop.permute.xlu0 %933 }
 0x206   : > { %1973 = vst.msk [vmem:[#allocation3 + $0x88] sm:$0xff] %vm1955_vm11, %v1894_v6  ;;  %v2004_v31 = vld [vmem:[#allocation3 + $0x80] sm:$0xff] }
 0x207   : > { %1148 = vrot.lane.b32.xlu1 %v1053_v57, %s2874_s15  ;;  %1010 = vst.msk [vmem:[#allocation3 + $0xa0] sm:$0xff] %vm989_vm6, %v934_v52  ;;  %1339 = vrot.lane.b32.xlu0 %v1245_v60, %s2875_s16  ;;  %s2499_s15 = sshll.u32 %s254_s14, 4  ;;  %s4046_s15 = int_to_ptr.vmem [resolvable:$true] %s2499_s15 }
 0x208   : > { %s2774_s9 = scalar_lea.vmem %s4046_s15, 16 }
 0x209   : > { %v1898_v48 = vpop.permute.xlu1 %1897  ;;  %v938_v26 = vpop.permute.xlu0 %937  ;;  %p2775_p11 = scmp.ne.s32.totalorder %s4046_s15, %s2774_s9 }
 0x20a   : > { %1975 = vst.msk [vmem:[#allocation3 + $0x98] sm:$0xff] %vm1955_vm11, %v1898_v48  ;;  %v2006_v53 = vld [vmem:[#allocation3 + $0x90] sm:$0xff] }
 0x20b   : > { %1337 = vrot.lane.b32.xlu1 %v1822_v37, %s2875_s16  ;;  %1012 = vst.msk [vmem:[#allocation3 + $0xb0] sm:$0xff] %vm989_vm6, %v938_v26  ;;  %1529 = vrot.lane.b32.xlu0 %v859_v61, %s2876_s17  ;;  %p2776_p12 = pnand %p2775_p11, %p2954_p5 }
 0x20d   : > { %v936_v20 = vpop.permute.xlu1 %935  ;;  %v2005_v22 = vld [vmem:[#allocation3 + $0x88] sm:$0xff]  ;;  %v1127_v13 = vpop.permute.xlu0 %1126  ;;  %p2777_p13 = pneg %p2776_p12 }
 0x20e   : > { %1011 = vst.msk [vmem:[#allocation3 + $0xa8] sm:$0xff] %vm989_vm6, %v936_v20  ;;  %v2028_v50 = vpack.c.bf16 %v2005_v22, %v2004_v31 }
 0x20f   : > { %1341 = vrot.lane.b32.xlu1 %v1246_v0, %s2875_s16  ;;  %1203 = vst.msk [vmem:[#allocation3 + $0xa0] sm:$0xff] %vm1182_vm7, %v1127_v13  ;;  %1533 = vrot.lane.b32.xlu0 %v1439_v23, %s2876_s17  ;;  %s260_s16 = scalar_lea.vmem [#allocation6], %s4034_s7 }
 0x210   : > { %2694 = vmatprep.mubr.msk.bf16.mxu1 %vm2056_vm12, %v2028_v50 }
 0x211   : > { %v940_v24 = vpop.permute.xlu1 %939  ;;  %v2007_v45 = vld [vmem:[#allocation3 + $0x98] sm:$0xff]  ;;  %v1131_v62 = vpop.permute.xlu0 %1130 }
 0x212   : > { %1013 = vst.msk [vmem:[#allocation3 + $0xb8] sm:$0xff] %vm989_vm6, %v940_v24  ;;  %v2029_v17 = vpack.c.bf16 %v2007_v45, %v2006_v53 }
 0x213   : > { %1531 = vrot.lane.b32.xlu1 %v860_v43, %s2876_s17  ;;  %1205 = vst.msk [vmem:[#allocation3 + $0xb0] sm:$0xff] %vm1182_vm7, %v1131_v62  ;;  %1722 = vrot.lane.b32.xlu0 %v1052_v46, %s2877_s20 }
 0x214   : > { %2695 = vmatmul.mubr.msk.bf16.vlgmr.msra.gmra.mrb[0].mxu1 %vm2056_vm12, %v2029_v17 }
 0x215   : > { %v1129_v29 = vpop.permute.xlu1 %1128  ;;  %v1320_v38 = vpop.permute.xlu0 %1319 }
 0x216   : > { %1204 = vst.msk [vmem:[#allocation3 + $0xa8] sm:$0xff] %vm1182_vm7, %v1129_v29 }
 0x217   : > { %1535 = vrot.lane.b32.xlu1 %v1440_v28, %s2876_s17  ;;  %1396 = vst.msk [vmem:[#allocation3 + $0xa0] sm:$0xff] %vm1375_vm8, %v1320_v38  ;;  %1726 = vrot.lane.b32.xlu0 %v1632_v5, %s2877_s20  ;;  %s2512_s17 = sshll.u32 %s260_s16, 4  ;;  %s4054_s17 = int_to_ptr.vmem [resolvable:$true] %s2512_s17 }
 0x219   : > { %v1133_v2 = vpop.permute.xlu1 %1132  ;;  %v1324_v30 = vpop.permute.xlu0 %1323 }
 0x21a   : > { %1206 = vst.msk [vmem:[#allocation3 + $0xb8] sm:$0xff] %vm1182_vm7, %v1133_v2 }
 0x21b   : > { %1724 = vrot.lane.b32.xlu1 %v1053_v57, %s2877_s20  ;;  %1398 = vst.msk [vmem:[#allocation3 + $0xb0] sm:$0xff] %vm1375_vm8, %v1324_v30  ;;  %1915 = vrot.lane.b32.xlu0 %v1245_v60, %s2878_s10 }
 0x21d   : > { %v1322_v8 = vpop.permute.xlu1 %1321  ;;  %v1514_v63 = vpop.permute.xlu0 %1513 }
 0x21e   : > { %1397 = vst.msk [vmem:[#allocation3 + $0xa8] sm:$0xff] %vm1375_vm8, %v1322_v8 }
 0x21f   : > { %1728 = vrot.lane.b32.xlu1 %v1633_v33, %s2877_s20  ;;  %1590 = vst.msk [vmem:[#allocation3 + $0xa0] sm:$0xff] %vm1569_vm9, %v1514_v63  ;;  %1919 = vrot.lane.b32.xlu0 %v1825_v34, %s2878_s10  ;;  %s4044_s20 = scalar_lea.hbm %s4125_s5, %s2647_s8 }
 0x221   : > { %v1326_v51 = vpop.permute.xlu1 %1325  ;;  %v1518_v16 = vpop.permute.xlu0 %1517 }
 0x222   : > { %1399 = vst.msk [vmem:[#allocation3 + $0xb8] sm:$0xff] %vm1375_vm8, %v1326_v51 }
 0x223   : > { %1917 = vrot.lane.b32.xlu1 %v1246_v0, %s2878_s10  ;;  %1592 = vst.msk [vmem:[#allocation3 + $0xb0] sm:$0xff] %vm1569_vm9, %v1518_v16 }
 0x225   : > { %v1516_v18 = vpop.permute.xlu1 %1515  ;;  %v1707_v19 = vpop.permute.xlu0 %1706 }
 0x226   : > { %1591 = vst.msk [vmem:[#allocation3 + $0xa8] sm:$0xff] %vm1569_vm9, %v1516_v18 }
 0x227   : > { %1921 = vrot.lane.b32.xlu1 %v1826_v27, %s2878_s10  ;;  %1783 = vst.msk [vmem:[#allocation3 + $0xa0] sm:$0xff] %vm1762_vm10, %v1707_v19  ;;  %s2879_s10 = smov [#allocation4]  }
 0x228   : > { %s2778_s11 = sshll.u32 %s2879_s10, 4  ;;  %s2779_s11 = int_to_ptr.vmem [resolvable:$false] %s2778_s11 }
 0x229   : > { %v1520_v25 = vpop.permute.xlu1 %1519  ;;  %v1711_v1 = vpop.permute.xlu0 %1710  ;;  %s2780_s12 = scalar_lea.vmem %s2779_s11, 32  ;;  %p2781_p0 = scmp.lt.s32.totalorder %s4046_s15, %s2779_s11 }
 0x22a   : > { %1593 = vst.msk [vmem:[#allocation3 + $0xb8] sm:$0xff] %vm1569_vm9, %v1520_v25  ;;  %p2782_p1 = scmp.lt.s32.totalorder %s2780_s12, %s2774_s9 }
 0x22b   : > { %1785 = vst.msk [vmem:[#allocation3 + $0xb0] sm:$0xff] %vm1762_vm10, %v1711_v1 }
 0x22c   : > { %p2783_p2 = por %p2782_p1, %p2781_p0 }
 0x22d   : > { %v1709_v59 = vpop.permute.xlu1 %1708  ;;  %v1900_v7 = vpop.permute.xlu0 %1899 }
 0x22e   : > { %1784 = vst.msk [vmem:[#allocation3 + $0xa8] sm:$0xff] %vm1762_vm10, %v1709_v59  ;;  %p2784_p3 = pnand %p2783_p2, %p2777_p13 }
 0x22f   : > { %v2680_v21 = vpop.f32.mrb[0].mxu0  ;;  %1976 = vst.msk [vmem:[#allocation3 + $0xa0] sm:$0xff] %vm1955_vm11, %v1900_v7 }
 0x230   : > { %2272 = vst.msk [vmem:[%s3840_s13 + $0x10] sm:$0xff] %vm304_vm0, %v2680_v21  ;;  %v2143_v55 = vpop.f32.mrb[1].mxu0  ;;  %v2374_v4 = vmul.f32 %v2680_v21, %v2680_v21  ;;  %v2305_v12 = vsel %vm304_vm0, %v2680_v21, 0.0 }
 0x231   : > { %2270 = vst.msk [vmem:[%s3840_s13] sm:$0xff] %vm304_vm0, %v2143_v55  ;;  %v2372_v35 = vmul.f32 %v2143_v55, %v2143_v55  ;;  %v1713_v9 = vpop.permute.xlu1 %1712  ;;  %v2681_v10 = vpop.f32.mrb[2].mxu0  ;;  %v2302_v14 = vsel %vm304_vm0, %v2143_v55, 0.0 }
 0x232   : > { %1786 = vst.msk [vmem:[#allocation3 + $0xb8] sm:$0xff] %vm1762_vm10, %v1713_v9  ;;  %v2146_v58 = vpop.f32.mrb[3].mxu0  ;;  %v1904_v36 = vpop.permute.xlu0 %1903  ;;  %v2375_v39 = vmul.f32 %v2681_v10, %v2681_v10  ;;  %v2407_v54 = vsel %vm304_vm0, %v2374_v4, 0.0  ;;  %v2307_v42 = vsel %vm304_vm0, %v2681_v10, 0.0 }
 0x233   : > { %2273 = vst.msk [vmem:[%s3840_s13 + $0x18] sm:$0xff] %vm304_vm0, %v2681_v10  ;;  %2271 = vst.msk [vmem:[%s3840_s13 + $0x8] sm:$0xff] %vm304_vm0, %v2146_v58  ;;  %v2303_v41 = vsel %vm304_vm0, %v2146_v58, 0.0  ;;  %v2373_v32 = vmul.f32 %v2146_v58, %v2146_v58  ;;  %v2404_v56 = vsel %vm304_vm0, %v2372_v35, 0.0 }
 0x234   : > { %v2304_v47 = vadd.f32 %v2303_v41, %v2302_v14  ;;  %1978 = vst.msk [vmem:[#allocation3 + $0xb0] sm:$0xff] %vm1955_vm11, %v1904_v36  ;;  %v2409_v3 = vsel %vm304_vm0, %v2375_v39, 0.0 }
 0x235   : > { %v2405_v37 = vsel %vm304_vm0, %v2373_v32, 0.0  ;;  %v1902_v44 = vpop.permute.xlu1 %1901 }
 0x236   : > { %v2306_v61 = vadd.f32 %v2305_v12, %v2304_v47  ;;  %v2406_v40 = vadd.f32 %v2405_v37, %v2404_v56  ;;  %1977 = vst.msk [vmem:[#allocation3 + $0xa8] sm:$0xff] %vm1955_vm11, %v1902_v44  ;;  %v942_v43 = vpop.permute.xlu0 %941  ;;  %v2008_v57 = vld [vmem:[#allocation3 + $0xa0] sm:$0xff] }
 0x237   : > { %1014 = vst.msk [vmem:[#allocation3 + $0xc0] sm:$0xff] %vm989_vm6, %v942_v43 }
 0x238   : > { %v2408_v11 = vadd.f32 %v2407_v54, %v2406_v40  ;;  %v2308_v46 = vadd.f32 %v2307_v42, %v2306_v61 }
 0x239   : > { %v1906_v49 = vpop.permute.xlu1 %1905 }
 0x23a   : > { %1979 = vst.msk [vmem:[#allocation3 + $0xb8] sm:$0xff] %vm1955_vm11, %v1906_v49  ;;  %v2410_v15 = vadd.f32 %v2409_v3, %v2408_v11  ;;  %v946_v6 = vpop.permute.xlu0 %945 }
 0x23b   : > { %1016 = vst.msk [vmem:[#allocation3 + $0xd0] sm:$0xff] %vm989_vm6, %v946_v6  ;;  %v2010_v31 = vld [vmem:[#allocation3 + $0xb0] sm:$0xff] }
 0x23d   : > { %v944_v60 = vpop.permute.xlu1 %943  ;;  %v2009_v52 = vld [vmem:[#allocation3 + $0xa8] sm:$0xff] }
 0x23e   : > { %1015 = vst.msk [vmem:[#allocation3 + $0xc8] sm:$0xff] %vm989_vm6, %v944_v60  ;;  %v2030_v48 = vpack.c.bf16 %v2009_v52, %v2008_v57  ;;  %v1135_v26 = vpop.permute.xlu0 %1134 }
 0x23f   : > { %1207 = vst.msk [vmem:[#allocation3 + $0xc0] sm:$0xff] %vm1182_vm7, %v1135_v26 }
 0x240   : > { %2698 = vmatprep.mubr.msk.bf16.mxu1 %vm2056_vm12, %v2030_v48 }
 0x241   : > { %v948_v0 = vpop.permute.xlu1 %947  ;;  %v2011_v20 = vld [vmem:[#allocation3 + $0xb8] sm:$0xff] }
 0x242   : > { %1017 = vst.msk [vmem:[#allocation3 + $0xd8] sm:$0xff] %vm989_vm6, %v948_v0  ;;  %v2031_v22 = vpack.c.bf16 %v2011_v20, %v2010_v31  ;;  %v1139_v50 = vpop.permute.xlu0 %1138 }
 0x243   : > { %1209 = vst.msk [vmem:[#allocation3 + $0xd0] sm:$0xff] %vm1182_vm7, %v1139_v50 }
 0x244   : > { %2699 = vmatmul.mubr.msk.bf16.gmra.mrb[4].mxu1 %vm2056_vm12, %v2031_v22 }
 0x245   : > { %v1137_v23 = vpop.permute.xlu1 %1136 }
 0x246   : > { %1208 = vst.msk [vmem:[#allocation3 + $0xc8] sm:$0xff] %vm1182_vm7, %v1137_v23  ;;  %v1328_v53 = vpop.permute.xlu0 %1327 }
 0x247   : > { %1400 = vst.msk [vmem:[#allocation3 + $0xc0] sm:$0xff] %vm1375_vm8, %v1328_v53 }
 0x249   : > { %v1141_v13 = vpop.permute.xlu1 %1140 }
 0x24a   : > { %1210 = vst.msk [vmem:[#allocation3 + $0xd8] sm:$0xff] %vm1182_vm7, %v1141_v13  ;;  %v1332_v24 = vpop.permute.xlu0 %1331 }
 0x24b   : > { %1402 = vst.msk [vmem:[#allocation3 + $0xd0] sm:$0xff] %vm1375_vm8, %v1332_v24 }
 0x24d   : > { %v1330_v45 = vpop.permute.xlu1 %1329 }
 0x24e   : > { %1401 = vst.msk [vmem:[#allocation3 + $0xc8] sm:$0xff] %vm1375_vm8, %v1330_v45  ;;  %v1522_v17 = vpop.permute.xlu0 %1521 }
 0x24f   : > { %1594 = vst.msk [vmem:[#allocation3 + $0xc0] sm:$0xff] %vm1569_vm9, %v1522_v17 }
 0x251   : > { %v1334_v62 = vpop.permute.xlu1 %1333 }
 0x252   : > { %1403 = vst.msk [vmem:[#allocation3 + $0xd8] sm:$0xff] %vm1375_vm8, %v1334_v62  ;;  %v1526_v28 = vpop.permute.xlu0 %1525 }
 0x253   : > { %1596 = vst.msk [vmem:[#allocation3 + $0xd0] sm:$0xff] %vm1569_vm9, %v1526_v28 }
 0x255   : > { %v1524_v29 = vpop.permute.xlu1 %1523 }
 0x256   : > { %1595 = vst.msk [vmem:[#allocation3 + $0xc8] sm:$0xff] %vm1569_vm9, %v1524_v29  ;;  %v1715_v38 = vpop.permute.xlu0 %1714 }
 0x257   : > { %v2684_v5 = vpop.f32.mrb[4].mxu0  ;;  %1787 = vst.msk [vmem:[#allocation3 + $0xc0] sm:$0xff] %vm1762_vm10, %v1715_v38 }
 0x258   : > { %2276 = vst.msk [vmem:[%s3840_s13 + $0x30] sm:$0xff] %vm304_vm0, %v2684_v5  ;;  %v2159_v2 = vpop.f32.mrb[5].mxu0  ;;  %v2378_v16 = vmul.f32 %v2684_v5, %v2684_v5  ;;  %v2313_v21 = vsel %vm304_vm0, %v2684_v5, 0.0 }
 0x259   : > { %2274 = vst.msk [vmem:[%s3840_s13 + $0x20] sm:$0xff] %vm304_vm0, %v2159_v2  ;;  %v2309_v30 = vsel %vm304_vm0, %v2159_v2, 0.0  ;;  %v2376_v33 = vmul.f32 %v2159_v2, %v2159_v2  ;;  %v1528_v8 = vpop.permute.xlu1 %1527  ;;  %v2685_v34 = vpop.f32.mrb[6].mxu0 }
 0x25a   : > { %v2310_v63 = vadd.f32 %v2309_v30, %v2308_v46  ;;  %1597 = vst.msk [vmem:[#allocation3 + $0xd8] sm:$0xff] %vm1569_vm9, %v1528_v8  ;;  %v2162_v51 = vpop.f32.mrb[7].mxu0  ;;  %v1719_v25 = vpop.permute.xlu0 %1718  ;;  %v2379_v7 = vmul.f32 %v2685_v34, %v2685_v34  ;;  %v2415_v58 = vsel %vm304_vm0, %v2378_v16, 0.0  ;;  %v2315_v4 = vsel %vm304_vm0, %v2685_v34, 0.0 }
 0x25b   : > { %2277 = vst.msk [vmem:[%s3840_s13 + $0x38] sm:$0xff] %vm304_vm0, %v2685_v34  ;;  %v2411_v27 = vsel %vm304_vm0, %v2376_v33, 0.0  ;;  %2275 = vst.msk [vmem:[%s3840_s13 + $0x28] sm:$0xff] %vm304_vm0, %v2162_v51  ;;  %v2311_v18 = vsel %vm304_vm0, %v2162_v51, 0.0  ;;  %v2377_v19 = vmul.f32 %v2162_v51, %v2162_v51 }
 0x25c   : > { %v2412_v1 = vadd.f32 %v2411_v27, %v2410_v15  ;;  %v2312_v59 = vadd.f32 %v2311_v18, %v2310_v63  ;;  %1789 = vst.msk [vmem:[#allocation3 + $0xd0] sm:$0xff] %vm1762_vm10, %v1719_v25  ;;  %v2417_v36 = vsel %vm304_vm0, %v2379_v7, 0.0 }
 0x25d   : > { %v2413_v55 = vsel %vm304_vm0, %v2377_v19, 0.0  ;;  %v1717_v35 = vpop.permute.xlu1 %1716 }
 0x25e   : > { %v2314_v9 = vadd.f32 %v2313_v21, %v2312_v59  ;;  %v2414_v10 = vadd.f32 %v2413_v55, %v2412_v1  ;;  %1788 = vst.msk [vmem:[#allocation3 + $0xc8] sm:$0xff] %vm1762_vm10, %v1717_v35  ;;  %v1908_v14 = vpop.permute.xlu0 %1907 }
 0x25f   : > { %1980 = vst.msk [vmem:[#allocation3 + $0xc0] sm:$0xff] %vm1955_vm11, %v1908_v14 }
 0x260   : > { %v2416_v41 = vadd.f32 %v2415_v58, %v2414_v10  ;;  %v2316_v32 = vadd.f32 %v2315_v4, %v2314_v9 }
 0x261   : > { %v1721_v47 = vpop.permute.xlu1 %1720 }
 0x262   : > { %1790 = vst.msk [vmem:[#allocation3 + $0xd8] sm:$0xff] %vm1762_vm10, %v1721_v47  ;;  %v3903_v12 = vadd.f32 %v2417_v36, %v2416_v41  ;;  %v1912_v56 = vpop.permute.xlu0 %1911 }
 0x263   : > { %1982 = vst.msk [vmem:[#allocation3 + $0xd0] sm:$0xff] %vm1955_vm11, %v1912_v56 }
 0x265   : > { %v1910_v39 = vpop.permute.xlu1 %1909 }
 0x266   : > { %1981 = vst.msk [vmem:[#allocation3 + $0xc8] sm:$0xff] %vm1955_vm11, %v1910_v39  ;;  %v950_v37 = vpop.permute.xlu0 %949  ;;  %v2012_v61 = vld [vmem:[#allocation3 + $0xc0] sm:$0xff] }
 0x267   : > { %1018 = vst.msk [vmem:[#allocation3 + $0xe0] sm:$0xff] %vm989_vm6, %v950_v37 }
 0x269   : > { %v1914_v44 = vpop.permute.xlu1 %1913 }
 0x26a   : > { %1983 = vst.msk [vmem:[#allocation3 + $0xd8] sm:$0xff] %vm1955_vm11, %v1914_v44  ;;  %v954_v40 = vpop.permute.xlu0 %953  ;;  %v2014_v11 = vld [vmem:[#allocation3 + $0xd0] sm:$0xff] }
 0x26b   : > { %1020 = vst.msk [vmem:[#allocation3 + $0xf0] sm:$0xff] %vm989_vm6, %v954_v40 }
 0x26d   : > { %v952_v54 = vpop.permute.xlu1 %951  ;;  %v2013_v42 = vld [vmem:[#allocation3 + $0xc8] sm:$0xff] }
 0x26e   : > { %1019 = vst.msk [vmem:[#allocation3 + $0xe8] sm:$0xff] %vm989_vm6, %v952_v54  ;;  %v2032_v43 = vpack.c.bf16 %v2013_v42, %v2012_v61  ;;  %v1143_v46 = vpop.permute.xlu0 %1142 }
 0x26f   : > { %1211 = vst.msk [vmem:[#allocation3 + $0xe0] sm:$0xff] %vm1182_vm7, %v1143_v46 }
 0x270   : > { %2702 = vmatprep.mubr.msk.bf16.mxu1 %vm2056_vm12, %v2032_v43 }
 0x271   : > { %v956_v3 = vpop.permute.xlu1 %955  ;;  %v2015_v49 = vld [vmem:[#allocation3 + $0xd8] sm:$0xff] }
 0x272   : > { %1021 = vst.msk [vmem:[#allocation3 + $0xf8] sm:$0xff] %vm989_vm6, %v956_v3  ;;  %v2033_v15 = vpack.c.bf16 %v2015_v49, %v2014_v11  ;;  %v1147_v57 = vpop.permute.xlu0 %1146 }
 0x273   : > { %1213 = vst.msk [vmem:[#allocation3 + $0xf0] sm:$0xff] %vm1182_vm7, %v1147_v57 }
 0x274   : > { %2703 = vmatmul.mubr.msk.bf16.gmra.mrb[8].mxu1 %vm2056_vm12, %v2033_v15 }
 0x275   : > { %v1145_v6 = vpop.permute.xlu1 %1144 }
 0x276   : > { %1212 = vst.msk [vmem:[#allocation3 + $0xe8] sm:$0xff] %vm1182_vm7, %v1145_v6  ;;  %v1336_v60 = vpop.permute.xlu0 %1335 }
 0x277   : > { %1404 = vst.msk [vmem:[#allocation3 + $0xe0] sm:$0xff] %vm1375_vm8, %v1336_v60 }
 0x279   : > { %v1149_v52 = vpop.permute.xlu1 %1148 }
 0x27a   : > { %1214 = vst.msk [vmem:[#allocation3 + $0xf8] sm:$0xff] %vm1182_vm7, %v1149_v52  ;;  %v1340_v48 = vpop.permute.xlu0 %1339 }
 0x27b   : > { %1406 = vst.msk [vmem:[#allocation3 + $0xf0] sm:$0xff] %vm1375_vm8, %v1340_v48 }
 0x27d   : > { %v1338_v31 = vpop.permute.xlu1 %1337 }
 0x27e   : > { %1405 = vst.msk [vmem:[#allocation3 + $0xe8] sm:$0xff] %vm1375_vm8, %v1338_v31  ;;  %v1530_v26 = vpop.permute.xlu0 %1529 }
 0x27f   : > { %1598 = vst.msk [vmem:[#allocation3 + $0xe0] sm:$0xff] %vm1569_vm9, %v1530_v26 }
 0x281   : > { %v1342_v0 = vpop.permute.xlu1 %1341 }
 0x282   : > { %1407 = vst.msk [vmem:[#allocation3 + $0xf8] sm:$0xff] %vm1375_vm8, %v1342_v0  ;;  %v1534_v20 = vpop.permute.xlu0 %1533 }
 0x283   : > { %1600 = vst.msk [vmem:[#allocation3 + $0xf0] sm:$0xff] %vm1569_vm9, %v1534_v20 }
 0x285   : > { %v1532_v22 = vpop.permute.xlu1 %1531 }
 0x286   : > { %1599 = vst.msk [vmem:[#allocation3 + $0xe8] sm:$0xff] %vm1569_vm9, %v1532_v22  ;;  %v1723_v23 = vpop.permute.xlu0 %1722 }
 0x287   : > { %v2688_v50 = vpop.f32.mrb[8].mxu0  ;;  %1791 = vst.msk [vmem:[#allocation3 + $0xe0] sm:$0xff] %vm1762_vm10, %v1723_v23 }
 0x288   : > { %2280 = vst.msk [vmem:[%s3840_s13 + $0x50] sm:$0xff] %vm304_vm0, %v2688_v50  ;;  %v2175_v53 = vpop.f32.mrb[9].mxu0  ;;  %v2382_v29 = vmul.f32 %v2688_v50, %v2688_v50  ;;  %v2321_v34 = vsel %vm304_vm0, %v2688_v50, 0.0 }
 0x289   : > { %2278 = vst.msk [vmem:[%s3840_s13 + $0x40] sm:$0xff] %vm304_vm0, %v2175_v53  ;;  %v2317_v13 = vsel %vm304_vm0, %v2175_v53, 0.0  ;;  %v2380_v24 = vmul.f32 %v2175_v53, %v2175_v53  ;;  %v1536_v45 = vpop.permute.xlu1 %1535  ;;  %v2689_v17 = vpop.f32.mrb[10].mxu0 }
 0x28a   : > { %v2318_v62 = vadd.f32 %v2317_v13, %v2316_v32  ;;  %1601 = vst.msk [vmem:[#allocation3 + $0xf8] sm:$0xff] %vm1569_vm9, %v1536_v45  ;;  %v2178_v28 = vpop.f32.mrb[11].mxu0  ;;  %v1727_v30 = vpop.permute.xlu0 %1726  ;;  %v2383_v63 = vmul.f32 %v2689_v17, %v2689_v17  ;;  %v2423_v19 = vsel %vm304_vm0, %v2382_v29, 0.0  ;;  %v2323_v25 = vsel %vm304_vm0, %v2689_v17, 0.0 }
 0x28b   : > { %2281 = vst.msk [vmem:[%s3840_s13 + $0x58] sm:$0xff] %vm304_vm0, %v2689_v17  ;;  %v2419_v5 = vsel %vm304_vm0, %v2380_v24, 0.0  ;;  %2279 = vst.msk [vmem:[%s3840_s13 + $0x48] sm:$0xff] %vm304_vm0, %v2178_v28  ;;  %v2319_v38 = vsel %vm304_vm0, %v2178_v28, 0.0  ;;  %v2381_v2 = vmul.f32 %v2178_v28, %v2178_v28 }
 0x28c   : > { %v2420_v33 = vadd.f32 %v2419_v5, %v3903_v12  ;;  %v2320_v8 = vadd.f32 %v2319_v38, %v2318_v62  ;;  %1793 = vst.msk [vmem:[#allocation3 + $0xf0] sm:$0xff] %vm1762_vm10, %v1727_v30  ;;  %v2425_v7 = vsel %vm304_vm0, %v2383_v63, 0.0 }
 0x28d   : > { %v2421_v51 = vsel %vm304_vm0, %v2381_v2, 0.0  ;;  %v1725_v16 = vpop.permute.xlu1 %1724 }
 0x28e   : > { %v2322_v27 = vadd.f32 %v2321_v34, %v2320_v8  ;;  %v2422_v18 = vadd.f32 %v2421_v51, %v2420_v33  ;;  %1792 = vst.msk [vmem:[#allocation3 + $0xe8] sm:$0xff] %vm1762_vm10, %v1725_v16  ;;  %v1916_v1 = vpop.permute.xlu0 %1915 }
 0x28f   : > { %1984 = vst.msk [vmem:[#allocation3 + $0xe0] sm:$0xff] %vm1955_vm11, %v1916_v1 }
 0x290   : > { %v2424_v59 = vadd.f32 %v2423_v19, %v2422_v18  ;;  %v2324_v21 = vadd.f32 %v2323_v25, %v2322_v27 }
 0x291   : > { %v1729_v55 = vpop.permute.xlu1 %1728 }
 0x292   : > { %1794 = vst.msk [vmem:[#allocation3 + $0xf8] sm:$0xff] %vm1762_vm10, %v1729_v55  ;;  %v2426_v35 = vadd.f32 %v2425_v7, %v2424_v59  ;;  %v1920_v9 = vpop.permute.xlu0 %1919 }
 0x293   : > { %1986 = vst.msk [vmem:[#allocation3 + $0xf0] sm:$0xff] %vm1955_vm11, %v1920_v9 }
 0x295   : > { %v1918_v10 = vpop.permute.xlu1 %1917 }
 0x296   : > { %1985 = vst.msk [vmem:[#allocation3 + $0xe8] sm:$0xff] %vm1955_vm11, %v1918_v10  ;;  %v2016_v4 = vld [vmem:[#allocation3 + $0xe0] sm:$0xff] }
 0x299   : > { %v1922_v58 = vpop.permute.xlu1 %1921 }
 0x29a   : > { %1987 = vst.msk [vmem:[#allocation3 + $0xf8] sm:$0xff] %vm1955_vm11, %v1922_v58  ;;  %v2018_v32 = vld [vmem:[#allocation3 + $0xf0] sm:$0xff] }
 0x29d   : > { %v2017_v14 = vld [vmem:[#allocation3 + $0xe8] sm:$0xff] }
 0x29e   : > { %v2034_v41 = vpack.c.bf16 %v2017_v14, %v2016_v4 }
 0x2a0   : > { %2706 = vmatprep.mubr.msk.bf16.mxu1 %vm2056_vm12, %v2034_v41 }
 0x2a1   : > { %v2019_v36 = vld [vmem:[#allocation3 + $0xf8] sm:$0xff] }
 0x2a2   : > { %v2035_v47 = vpack.c.bf16 %v2019_v36, %v2018_v32 }
 0x2a4   : > { %2707 = vmatmul.mubr.msk.bf16.gmra.mrb[12].mxu1 %vm2056_vm12, %v2035_v47 }
 0x2b7   : > { %v2692_v12 = vpop.f32.mrb[12].mxu0 }
 0x2b8   : > { %2284 = vst.msk [vmem:[%s3840_s13 + $0x70] sm:$0xff] %vm304_vm0, %v2692_v12  ;;  %v2191_v56 = vpop.f32.mrb[13].mxu0  ;;  %v2386_v54 = vmul.f32 %v2692_v12, %v2692_v12  ;;  %v2329_v49 = vsel %vm304_vm0, %v2692_v12, 0.0 }
 0x2b9   : > { %2282 = vst.msk [vmem:[%s3840_s13 + $0x60] sm:$0xff] %vm304_vm0, %v2191_v56  ;;  %v2325_v39 = vsel %vm304_vm0, %v2191_v56, 0.0  ;;  %v2384_v37 = vmul.f32 %v2191_v56, %v2191_v56  ;;  %v2693_v44 = vpop.f32.mrb[14].mxu0 }
 0x2ba   : > { %v2326_v61 = vadd.f32 %v2325_v39, %v2324_v21  ;;  %2285 = vst.msk [vmem:[%s3840_s13 + $0x78] sm:$0xff] %vm304_vm0, %v2693_v44  ;;  %v2194_v40 = vpop.f32.mrb[15].mxu0  ;;  %v2387_v15 = vmul.f32 %v2693_v44, %v2693_v44  ;;  %v2431_v52 = vsel %vm304_vm0, %v2386_v54, 0.0  ;;  %v2331_v48 = vsel %vm304_vm0, %v2693_v44, 0.0 }
 0x2bb   : > { %v2427_v42 = vsel %vm304_vm0, %v2384_v37, 0.0  ;;  %2283 = vst.msk [vmem:[%s3840_s13 + $0x68] sm:$0xff] %vm304_vm0, %v2194_v40  ;;  %v2327_v43 = vsel %vm304_vm0, %v2194_v40, 0.0  ;;  %v2385_v11 = vmul.f32 %v2194_v40, %v2194_v40 }
 0x2bc   : > { %v2428_v46 = vadd.f32 %v2427_v42, %v2426_v35  ;;  %v2328_v3 = vadd.f32 %v2327_v43, %v2326_v61  ;;  %v2433_v0 = vsel %vm304_vm0, %v2387_v15, 0.0 }
 0x2bd   : > { %v2429_v57 = vsel %vm304_vm0, %v2385_v11, 0.0 }
 0x2be   : > { %v2330_v6 = vadd.f32 %v2329_v49, %v2328_v3  ;;  %v2430_v60 = vadd.f32 %v2429_v57, %v2428_v46 }
 0x2c0   : > { %v2432_v31 = vadd.f32 %v2431_v52, %v2430_v60  ;;  %v2332_v26 = vadd.f32 %v2331_v48, %v2330_v6 }
 0x2c2   : > { %v2434_v20 = vadd.f32 %v2433_v0, %v2432_v31 }
 0x2e7   : > { %v2696_v22 = vpop.f32.mrb[0].mxu1 }
 0x2e8   : > { %2288 = vst.msk [vmem:[%s3840_s13 + $0x90] sm:$0xff] %vm304_vm0, %v2696_v22  ;;  %v2207_v50 = vpop.f32.mrb[1].mxu1  ;;  %v2390_v17 = vmul.f32 %v2696_v22, %v2696_v22  ;;  %v2337_v2 = vsel %vm304_vm0, %v2696_v22, 0.0 }
 0x2e9   : > { %2286 = vst.msk [vmem:[%s3840_s13 + $0x80] sm:$0xff] %vm304_vm0, %v2207_v50  ;;  %v2333_v23 = vsel %vm304_vm0, %v2207_v50, 0.0  ;;  %v2388_v53 = vmul.f32 %v2207_v50, %v2207_v50  ;;  %v2697_v13 = vpop.f32.mrb[2].mxu1 }
 0x2ea   : > { %v2334_v24 = vadd.f32 %v2333_v23, %v2332_v26  ;;  %2289 = vst.msk [vmem:[%s3840_s13 + $0x98] sm:$0xff] %vm304_vm0, %v2697_v13  ;;  %v2210_v45 = vpop.f32.mrb[3].mxu1  ;;  %v2391_v30 = vmul.f32 %v2697_v13, %v2697_v13  ;;  %v2439_v63 = vsel %vm304_vm0, %v2390_v17, 0.0  ;;  %v2339_v51 = vsel %vm304_vm0, %v2697_v13, 0.0 }
 0x2eb   : > { %v2435_v62 = vsel %vm304_vm0, %v2388_v53, 0.0  ;;  %2287 = vst.msk [vmem:[%s3840_s13 + $0x88] sm:$0xff] %vm304_vm0, %v2210_v45  ;;  %v2335_v28 = vsel %vm304_vm0, %v2210_v45, 0.0  ;;  %v2389_v29 = vmul.f32 %v2210_v45, %v2210_v45 }
 0x2ec   : > { %v2436_v5 = vadd.f32 %v2435_v62, %v2434_v20  ;;  %v2336_v38 = vadd.f32 %v2335_v28, %v2334_v24  ;;  %v2441_v18 = vsel %vm304_vm0, %v2391_v30, 0.0 }
 0x2ed   : > { %v2437_v33 = vsel %vm304_vm0, %v2389_v29, 0.0 }
 0x2ee   : > { %v2338_v8 = vadd.f32 %v2337_v2, %v2336_v38  ;;  %v2438_v34 = vadd.f32 %v2437_v33, %v2436_v5 }
 0x2f0   : > { %v2440_v16 = vadd.f32 %v2439_v63, %v2438_v34  ;;  %v2340_v27 = vadd.f32 %v2339_v51, %v2338_v8 }
 0x2f2   : > { %v2442_v19 = vadd.f32 %v2441_v18, %v2440_v16 }
 0x317   : > { %v2700_v25 = vpop.f32.mrb[4].mxu1 }
 0x318   : > { %2292 = vst.msk [vmem:[%s3840_s13 + $0xb0] sm:$0xff] %vm304_vm0, %v2700_v25  ;;  %v2223_v1 = vpop.f32.mrb[5].mxu1  ;;  %v2394_v9 = vmul.f32 %v2700_v25, %v2700_v25  ;;  %v2345_v32 = vsel %vm304_vm0, %v2700_v25, 0.0 }
 0x319   : > { %2290 = vst.msk [vmem:[%s3840_s13 + $0xa0] sm:$0xff] %vm304_vm0, %v2223_v1  ;;  %v2341_v59 = vsel %vm304_vm0, %v2223_v1, 0.0  ;;  %v2392_v21 = vmul.f32 %v2223_v1, %v2223_v1  ;;  %v2701_v7 = vpop.f32.mrb[6].mxu1 }
 0x31a   : > { %v2342_v55 = vadd.f32 %v2341_v59, %v2340_v27  ;;  %2293 = vst.msk [vmem:[%s3840_s13 + $0xb8] sm:$0xff] %vm304_vm0, %v2701_v7  ;;  %v2226_v35 = vpop.f32.mrb[7].mxu1  ;;  %v2395_v36 = vmul.f32 %v2701_v7, %v2701_v7  ;;  %v2447_v39 = vsel %vm304_vm0, %v2394_v9, 0.0  ;;  %v2347_v37 = vsel %vm304_vm0, %v2701_v7, 0.0 }
 0x31b   : > { %v2443_v10 = vsel %vm304_vm0, %v2392_v21, 0.0  ;;  %2291 = vst.msk [vmem:[%s3840_s13 + $0xa8] sm:$0xff] %vm304_vm0, %v2226_v35  ;;  %v2343_v58 = vsel %vm304_vm0, %v2226_v35, 0.0  ;;  %v2393_v4 = vmul.f32 %v2226_v35, %v2226_v35 }
 0x31c   : > { %v2444_v14 = vadd.f32 %v2443_v10, %v2442_v19  ;;  %v2344_v41 = vadd.f32 %v2343_v58, %v2342_v55  ;;  %v2449_v40 = vsel %vm304_vm0, %v2395_v36, 0.0 }
 0x31d   : > { %v2445_v47 = vsel %vm304_vm0, %v2393_v4, 0.0 }
 0x31e   : > { %v2346_v12 = vadd.f32 %v2345_v32, %v2344_v41  ;;  %v2446_v56 = vadd.f32 %v2445_v47, %v2444_v14 }
 0x320   : > { %v2448_v44 = vadd.f32 %v2447_v39, %v2446_v56  ;;  %v2348_v61 = vadd.f32 %v2347_v37, %v2346_v12 }
 0x322   : > { %v2450_v54 = vadd.f32 %v2449_v40, %v2448_v44 }
 0x347   : > { %v2704_v42 = vpop.f32.mrb[8].mxu1 }
 0x348   : > { %2296 = vst.msk [vmem:[%s3840_s13 + $0xd0] sm:$0xff] %vm304_vm0, %v2704_v42  ;;  %v2239_v43 = vpop.f32.mrb[9].mxu1  ;;  %v2398_v57 = vmul.f32 %v2704_v42, %v2704_v42  ;;  %v2353_v26 = vsel %vm304_vm0, %v2704_v42, 0.0 }
 0x349   : > { %2294 = vst.msk [vmem:[%s3840_s13 + $0xc0] sm:$0xff] %vm304_vm0, %v2239_v43  ;;  %v2349_v11 = vsel %vm304_vm0, %v2239_v43, 0.0  ;;  %v2396_v46 = vmul.f32 %v2239_v43, %v2239_v43  ;;  %v2705_v3 = vpop.f32.mrb[10].mxu1 }
 0x34a   : > { %v2350_v49 = vadd.f32 %v2349_v11, %v2348_v61  ;;  %2297 = vst.msk [vmem:[%s3840_s13 + $0xd8] sm:$0xff] %vm304_vm0, %v2705_v3  ;;  %v2242_v15 = vpop.f32.mrb[11].mxu1  ;;  %v2399_v0 = vmul.f32 %v2705_v3, %v2705_v3  ;;  %v2455_v23 = vsel %vm304_vm0, %v2398_v57, 0.0  ;;  %v2355_v53 = vsel %vm304_vm0, %v2705_v3, 0.0 }
 0x34b   : > { %v2451_v6 = vsel %vm304_vm0, %v2396_v46, 0.0  ;;  %2295 = vst.msk [vmem:[%s3840_s13 + $0xc8] sm:$0xff] %vm304_vm0, %v2242_v15  ;;  %v2351_v60 = vsel %vm304_vm0, %v2242_v15, 0.0  ;;  %v2397_v52 = vmul.f32 %v2242_v15, %v2242_v15 }
 0x34c   : > { %v2452_v48 = vadd.f32 %v2451_v6, %v2450_v54  ;;  %v2352_v31 = vadd.f32 %v2351_v60, %v2350_v49  ;;  %v2457_v45 = vsel %vm304_vm0, %v2399_v0, 0.0 }
 0x34d   : > { %v2453_v20 = vsel %vm304_vm0, %v2397_v52, 0.0 }
 0x34e   : > { %v2354_v22 = vadd.f32 %v2353_v26, %v2352_v31  ;;  %v2454_v50 = vadd.f32 %v2453_v20, %v2452_v48 }
 0x350   : > { %v2456_v13 = vadd.f32 %v2455_v23, %v2454_v50  ;;  %v2356_v24 = vadd.f32 %v2355_v53, %v2354_v22 }
 0x352   : > { %v2458_v17 = vadd.f32 %v2457_v45, %v2456_v13 }
 0x377   : > { %v2708_v62 = vpop.f32.mrb[12].mxu1 }
 0x378   : > { %2300 = vst.msk [vmem:[%s3840_s13 + $0xf0] sm:$0xff] %vm304_vm0, %v2708_v62  ;;  %v2255_v28 = vpop.f32.mrb[13].mxu1  ;;  %v2402_v33 = vmul.f32 %v2708_v62, %v2708_v62  ;;  %v2361_v27 = vsel %vm304_vm0, %v2708_v62, 0.0 }
 0x379   : > { %2298 = vst.msk [vmem:[%s3840_s13 + $0xe0] sm:$0xff] %vm304_vm0, %v2255_v28  ;;  %v2357_v29 = vsel %vm304_vm0, %v2255_v28, 0.0  ;;  %v2400_v5 = vmul.f32 %v2255_v28, %v2255_v28  ;;  %v2709_v38 = vpop.f32.mrb[14].mxu1 }
 0x37a   : > { %v2358_v2 = vadd.f32 %v2357_v29, %v2356_v24  ;;  %2301 = vst.msk [vmem:[%s3840_s13 + $0xf8] sm:$0xff] %vm304_vm0, %v2709_v38  ;;  %v2258_v30 = vpop.f32.mrb[15].mxu1  ;;  %v2403_v18 = vmul.f32 %v2709_v38, %v2709_v38  ;;  %v2463_v59 = vsel %vm304_vm0, %v2402_v33, 0.0  ;;  %v2363_v21 = vsel %vm304_vm0, %v2709_v38, 0.0 }
 0x37b   : > { %v2459_v8 = vsel %vm304_vm0, %v2400_v5, 0.0  ;;  %2299 = vst.msk [vmem:[%s3840_s13 + $0xe8] sm:$0xff] %vm304_vm0, %v2258_v30  ;;  %v2359_v34 = vsel %vm304_vm0, %v2258_v30, 0.0  ;;  %v2401_v63 = vmul.f32 %v2258_v30, %v2258_v30 }
 0x37c   : > { %v2460_v51 = vadd.f32 %v2459_v8, %v2458_v17  ;;  %v2360_v16 = vadd.f32 %v2359_v34, %v2358_v2  ;;  %v2465_v35 = vsel %vm304_vm0, %v2403_v18, 0.0 }
 0x37d   : > { %v2461_v19 = vsel %vm304_vm0, %v2401_v63, 0.0 }
 0x37e   : > { %v2362_v25 = vadd.f32 %v2361_v27, %v2360_v16  ;;  %v2462_v1 = vadd.f32 %v2461_v19, %v2460_v51 }
 0x380   : > { %v2364_v7 = vadd.f32 %v2363_v21, %v2362_v25  ;;  %v2464_v55 = vadd.f32 %v2463_v59, %v2462_v1 }
 0x382   : > { %v2365_v9 = vrot.slane %v2364_v7, 4  ;;  %v2466_v10 = vadd.f32 %v2465_v35, %v2464_v55 }
 0x384   : > { %v2366_v58 = vadd.f32 %v2365_v9, %v2364_v7  ;;  %v2467_v4 = vrot.slane %v2466_v10, 4 }
 0x386   : > { %v2367_v14 = vrot.slane %v2366_v58, 2  ;;  %v2468_v41 = vadd.f32 %v2467_v4, %v2466_v10 }
 0x388   : > { %v2368_v32 = vadd.f32 %v2367_v14, %v2366_v58  ;;  %v2469_v36 = vrot.slane %v2468_v41, 2 }
 0x38a   : > { %v2369_v47 = vrot.slane %v2368_v32, 1  ;;  %v2470_v12 = vadd.f32 %v2469_v36, %v2468_v41 }
 0x38c   : > { %v2370_v56 = vadd.f32 %v2369_v47, %v2368_v32  ;;  %v2471_v39 = vrot.slane %v2470_v12, 1 }
 0x38e   : > { %2371 = vst.msk [vmem:[%s254_s14] sm:$0x1] %vm314_vm2, %v2370_v56  ;;  %v2472_v37 = vadd.f32 %v2471_v39, %v2470_v12 }
 0x38f   : > { %2787 = shalt.err (!%p2784_p3)
}
 0x390   : > { %s2788_s13 = scalar_lea.hbm %s4044_s20, 16  ;;  %s2792_s18 = scalar_lea.hbm %s4125_s5, 32 }
 0x391   : > { %p2789_p4 = scmp.ne.s32.totalorder %s4044_s20, %s2788_s13  ;;  %p2793_p9 = scmp.lt.u32.totalorder %s4044_s20, %s4125_s5 }
 0x392   : > { %p2794_p10 = scmp.lt.u32.totalorder %s2792_s18, %s2788_s13  ;;  %p2796_p12 = scmp.lt.u32.totalorder %s2788_s13, %s4044_s20 }
 0x393   : > { %p2790_p7 = pnand %p2789_p4, %p2954_p5 }
 0x394   : > { %p2795_p11 = por %p2794_p10, %p2793_p9 }
 0x395   : > { %p2791_p8 = pneg %p2790_p7 }
 0x396   : > { %p2797_p13 = por %p2796_p12, %p2795_p11 }
 0x398   : > { %p2798_p0 = pnand %p2797_p13, %p2791_p8 }
 0x39a   : > { %2801 = shalt.err (!%p2798_p0)
}
 0x39b   : > { %2718 = dma.vmem_to_hbm [thread:$0]  (%p2954_p5), %s4046_s15, 16, %s4044_s20, %s2480_s27   ;;  %2473 = vst.msk [vmem:[%s260_s16] sm:$0x1] %vm314_vm2, %v2472_v37 }
 0x39c   : > { %s2484_s24 = scalar_lea.sflag [#allocation7], %s4034_s7  ;;  %s2802_s9 = scalar_lea.vmem %s4054_s17, 16 }
 0x39d   : > { %p2803_p1 = scmp.ne.s32.totalorder %s4054_s17, %s2802_s9  ;;  %s2880_s10 = smov [#allocation6]  }
 0x39e   : > { %s2806_s11 = sshll.u32 %s2880_s10, 4  ;;  %s2807_s11 = int_to_ptr.vmem [resolvable:$false] %s2806_s11 }
 0x39f   : > { %p2804_p2 = pnand %p2803_p1, %p2954_p5  ;;  %s2808_s12 = scalar_lea.vmem %s2807_s11, 32 }
 0x3a0   : > { %p2809_p4 = scmp.lt.s32.totalorder %s4054_s17, %s2807_s11  ;;  %p2810_p7 = scmp.lt.s32.totalorder %s2808_s12, %s2802_s9 }
 0x3a1   : > { %p2805_p3 = pneg %p2804_p2 }
 0x3a2   : > { %p2811_p8 = por %p2810_p7, %p2809_p4 }
 0x3a4   : > { %p2812_p9 = pnand %p2811_p8, %p2805_p3 }
 0x3a6   : > { %2815 = shalt.err (!%p2812_p9)
}
 0x3a7   : > { %s2816_s7 = scalar_lea.hbm %s4052_s26, 16  ;;  %s2820_s20 = scalar_lea.hbm %s4126_s6, 32 }
 0x3a8   : > { %p2817_p10 = scmp.ne.s32.totalorder %s4052_s26, %s2816_s7  ;;  %p2821_p13 = scmp.lt.u32.totalorder %s4052_s26, %s4126_s6 }
 0x3a9   : > { %p2822_p0 = scmp.lt.u32.totalorder %s2820_s20, %s2816_s7  ;;  %p2824_p2 = scmp.lt.u32.totalorder %s2816_s7, %s4052_s26 }
 0x3aa   : > { %p2818_p11 = pnand %p2817_p10, %p2954_p5 }
 0x3ab   : > { %p2823_p1 = por %p2822_p0, %p2821_p13 }
 0x3ac   : > { %p2819_p12 = pneg %p2818_p11 }
 0x3ad   : > { %p2825_p3 = por %p2824_p2, %p2823_p1 }
 0x3af   : > { %p2826_p4 = pnand %p2825_p3, %p2819_p12 }
 0x3b1   : > { %2829 = shalt.err (!%p2826_p4)
}
 0x3b2   : > { %2719 = dma.vmem_to_hbm [thread:$0]  (%p2954_p5), %s4054_s17, 16, %s4052_s26, %s2484_s24  }
 0x3b3 PF: > { %p2729_p7 = scmp.ge.s32.totalorder %s2868_s22, 2  ;;  %s2532_s8 = sand.u32 1, %s2856_s1  }
 0x3b4   : > { %s2533_s14 = scalar_lea.sflag [#allocation5], %s2532_s8 }
 0x3b5   : > { %p2723_p8 = pnand %p2729_p7, %p2958_p6 }
 0x3b7   : > { %2847 = dma.done.wait (!%p2723_p8), %s2533_s14, 16  }
 0x3b8   : > { %2849 = vsyncadd (!%p2723_p8), %s2533_s14, 4294967280  ;;  %s2541_s18 = scalar_lea.sflag [#allocation7], %s2532_s8 }
 0x3b9   : > { %2851 = dma.done.wait (!%p2723_p8), %s2541_s18, 16  }
 0x3ba   : > { %2853 = vsyncadd (!%p2723_p8), %s2541_s18, 4294967280  ;;  %p20_p5 = scmp.ge.s32.totalorder %s2941_s25, 4   ;;  %s4129_s1 = smov %s2860_s21 }
 0x3bb   : > { %s4130_s21 = smov %s2864_s2  ;;  %s4131_s2 = smov %s2952_s28 }
 0x3bc   : > { %s4132_s22 = smov %s2941_s25  ;;  %22 = sbr.rel (!%p20_p5) target bundleno = 5 (0x5), region = 103 }
 0x3c3   :  { %2545 = vsyncpa [#allocation5], 1 }
 0x3c4   :  { %2547 = vsyncpa [#allocation5 + $0x1], 1 }
 0x3c5   :  { %2548 = vsyncpa [#allocation7], 1 }
 0x3c6   :  { %2550 = vsyncpa [#allocation7 + $0x1], 1 }

</bundles_post_ra>
